<compile_context>
chip_gen: v5e
topology: v5e:2x2
jax: 0.10.0
libtpu: 0.0.40
codegen_flags: <defaults>
</compile_context>

<pallas_src>
import math
import numpy as np
import jax
import jax.numpy as jnp
from jax.experimental import pallas as pl
from jax.experimental.pallas import tpu as pltpu


def _interp_matrix(in_size: int, out_size: int) -> np.ndarray:
    """F.interpolate(mode='linear', align_corners=True) as an (out, in) matrix."""
    Wm = np.zeros((out_size, in_size), dtype=np.float32)
    if out_size == 1:
        Wm[0, 0] = 1.0
    else:
        scale = (in_size - 1) / (out_size - 1)
        for j in range(out_size):
            src = j * scale
            lo = int(math.floor(src))
            hi = min(lo + 1, in_size - 1)
            frac = src - lo
            Wm[j, lo] += 1.0 - frac
            Wm[j, hi] += frac
    return Wm


def _block_interp_matrix(w_interp: np.ndarray, width: int, r: int) -> np.ndarray:
    """r-way block-diagonal (r*Kw, r*W) matrix so that the PyTorch
    `view(b*h*w, t) -> interpolate -> view(b, C_out, h, w)` resample becomes a
    single lane-dense matmul in the row-packed (h/r, r*w) output orientation.

    Within one row block, output column w uses the C_in consecutive flat-memory
    inputs starting at (w // C_out) * C_in, weighted with interpolation row
    (w % C_out).  Requires width % C_out == 0.
    """
    c_out, c_in = w_interp.shape
    assert width % c_out == 0
    kw = (c_in * width) // c_out
    M = np.zeros((kw, width), dtype=np.float32)
    for w in range(width):
        blk, j = divmod(w, c_out)
        M[blk * c_in:(blk + 1) * c_in, w] = w_interp[j, :]
    if r == 1:
        return M
    Mr = np.zeros((r * kw, r * width), dtype=np.float32)
    for i in range(r):
        Mr[i * kw:(i + 1) * kw, i * width:(i + 1) * width] = M
    return Mr


def _resample_norm_kernel(x_ref, m_ref, mask_ref, gb_ref, o_ref):
    # x_ref:    (B, CG, H/r, r*Kw)   row-packed input slab for this channel group
    # m_ref:    (r*Kw, r*W)          r-way block-diagonal interpolation matrix
    # mask_ref: (1, CG, H/r, r*W)    gate mask (broadcasts over batch)
    # gb_ref:   (2, CG, 1, 1)        [gamma; beta] BN affine params
    # o_ref:    (B, CG, H/r, r*W)
    B, CG, Hr, rW = o_ref.shape
    rKw = x_ref.shape[-1]
    eps = 1e-5
    inv_n = 1.0 / float(B * Hr * rW)        # == 1 / (B * H * W)

    # --- channel resample: one lane-dense matmul straight into packed layout ---
    xm = x_ref[...].reshape(B * CG * Hr, rKw)            # leading-dim collapse
    y = jnp.dot(xm, m_ref[...], preferred_element_type=jnp.float32)
    y = y.reshape(B, CG, Hr, rW)

    # --- sigmoid gate * 2 (mask broadcasts over batch) ---
    g = y * (jax.nn.sigmoid(mask_ref[...]) * 2.0)

    # --- BatchNorm2d (training mode), one-pass statistics ---
    # NOTE: var = E[g^2] - mean^2 is cancellation-prone only for |mean| >> std;
    # fine for sigmoid-gated activations at N = B*H*W here.
    def _sum_bhw(v):                                     # reduce over (B, H, W)
        v = jnp.sum(v, axis=3, keepdims=True)
        v = jnp.sum(v, axis=2, keepdims=True)
        return jnp.sum(v, axis=0, keepdims=True)         # (1, CG, 1, 1)

    s1 = _sum_bhw(g)
    s2 = _sum_bhw(g * g)
    mean = s1 * inv_n
    var = s2 * inv_n - mean * mean                       # biased variance
    inv = jax.lax.rsqrt(var + eps)

    gb = gb_ref[...]                                     # (2, CG, 1, 1)
    gamma = gb[0:1]
    beta = gb[1:2]
    o_ref[...] = ((g - mean) * (inv * gamma) + beta).astype(o_ref.dtype)


def _device_kind() -> str:
    try:
        return jax.devices()[0].device_kind.lower()
    except Exception:
        return ""


def resample_norm_forward(x, w_interp, mask, gamma, beta):
    """ResampleNorm forward.  x: (B, C_in, H, W) f32 NCHW; w_interp: (C_out, C_in) numpy."""
    B, C_in, H, W = x.shape
    C_out = int(w_interp.shape[0])
    # The single-matmul reformulation needs W % C_out == 0 (true for the
    # module's hard-coded 64x64 mask and the usual channel counts).
    # TODO(synk): add a fallback path for W % C_out != 0.
    assert W % C_out == 0, "reformulated resample requires W % C_out == 0"
    Kw = (C_in * W) // C_out

    kind = _device_kind()
    is_v5e = ("v5 lite" in kind) or ("v5e" in kind) or ("v5litepod" in kind)
    is_v7x = ("v7" in kind) or ("tpu7" in kind)

    # Row-packing factor: target 128 lanes on v5e (native MXU/result width),
    # 256 lanes on v6e/v7x; must divide H.
    target_lanes = 128 if is_v5e else 256
    r = max(1, target_lanes // W)
    r = min(r, H)
    while r > 1 and H % r != 0:
        r -= 1

    Hr = H // r
    rKw = r * Kw
    rW = r * W

    # One grid step per TensorCore: v5e/v6e have 1 TC/chip, v7x has 2.
    num_groups = 2 if (is_v7x and C_out % 2 == 0) else 1

    m_blk = jnp.asarray(_block_interp_matrix(np.asarray(w_interp), W, r))  # (rKw, rW)

    # Pure row-major reshapes (replicating torch .contiguous().view semantics;
    # these lower to bitcasts — no HBM relayout copy).
    x_r = x.reshape(B, C_out, Hr, rKw)
    mask_r = mask.reshape(1, C_out, Hr, rW)
    gb = jnp.stack(
        [jnp.asarray(gamma).reshape(C_out), jnp.asarray(beta).reshape(C_out)],
        axis=0).reshape(2, C_out, 1, 1)

    def _build(ng, cg, semantics):
        return pl.pallas_call(
            _resample_norm_kernel,
            out_shape=jax.ShapeDtypeStruct((B, C_out, Hr, rW), jnp.float32),
            grid=(ng,),
            in_specs=[
                pl.BlockSpec((B, cg, Hr, rKw), lambda g: (0, g, 0, 0)),
                pl.BlockSpec((rKw, rW), lambda g: (0, 0)),
                pl.BlockSpec((1, cg, Hr, rW), lambda g: (0, g, 0, 0)),
                pl.BlockSpec((2, cg, 1, 1), lambda g: (0, g, 0, 0)),
            ],
            out_specs=pl.BlockSpec((B, cg, Hr, rW), lambda g: (0, g, 0, 0)),
            compiler_params=pltpu.CompilerParams(dimension_semantics=semantics),
        )

    out_packed = None
    if num_groups >= 2:
        semantics_attempts = []
        try:
            # Explicit per-TensorCore sharding of the 2 channel groups on v7x.
            semantics_attempts.append((pltpu.CORE_PARALLEL,))
        except AttributeError:
            pass
        semantics_attempts.append(("parallel",))
        for sem in semantics_attempts:
            try:
                out_packed = _build(num_groups, C_out // num_groups, sem)(
                    x_r, m_blk, mask_r, gb)
                break
            except Exception:
                out_packed = None
    if out_packed is None:
        # Single-TC chips (v5e/v6e) or fallback: one invocation, no grid overhead.
        out_packed = _build(1, C_out, ("arbitrary",))(x_r, m_blk, mask_r, gb)

    # Pure row-major reshape back to the module's NCHW output layout (bitcast).
    return out_packed.reshape(B, C_out, H, W)


def reference(x, w_interp, mask, gamma, beta):
    """Pure-JAX replica of the PyTorch forward (training-mode BatchNorm)."""
    B, C_in, H, W = x.shape
    C_out = w_interp.shape[0]
    xf = x.reshape(B * H * W, C_in)            # same flat reinterpretation as torch .view
    yf = xf @ w_interp.T
    y = yf.reshape(B, C_out, H, W)
    y = y * jax.nn.sigmoid(mask) * 2.0
    mean = y.mean(axis=(0, 2, 3), keepdims=True)
    var = ((y - mean) ** 2).mean(axis=(0, 2, 3), keepdims=True)
    yn = (y - mean) / jnp.sqrt(var + 1e-5)
    return yn * gamma.reshape(1, -1, 1, 1) + beta.reshape(1, -1, 1, 1)


if __name__ == "__main__":
    # mask parameter is hard-coded to (1, C_out, 64, 64) in the module, so the
    # spatial size must be 64x64 for the PyTorch broadcast to be valid.
    B, C_in, C_out, H, W = 2, 4, 8, 64, 64
    key = jax.random.PRNGKey(0)
    kx, km = jax.random.split(key)

    x = jax.random.normal(kx, (B, C_in, H, W), dtype=jnp.float32)

    # Deterministic parameter init (module default is ones for the mask;
    # perturb slightly so the sigmoid gate is non-trivial).
    mask = jnp.ones((1, C_out, H, W), jnp.float32) + 0.1 * jax.random.normal(
        km, (1, C_out, H, W), dtype=jnp.float32)
    gamma = 1.0 + 0.05 * jnp.arange(C_out, dtype=jnp.float32)   # BN weight
    beta = 0.01 * jnp.arange(C_out, dtype=jnp.float32)          # BN bias
    w_interp = _interp_matrix(C_in, C_out)                      # (C_out, C_in) numpy

    out = resample_norm_forward(x, w_interp, mask, gamma, beta)
    out = jax.block_until_ready(out)

    ref = reference(x, jnp.asarray(w_interp), mask, gamma, beta)
    assert out.shape == (B, C_out, H, W)
    err = float(jnp.max(jnp.abs(out - ref)))
    assert jnp.allclose(out, ref, atol=1e-3, rtol=1e-3), err
    print("KERNEL_OK")
</pallas_src>

<mosaic_0001>
module attributes {stable_mosaic.version = 11 : i64} {
  func.func @_resample_norm_kernel(%arg0: i32, %arg1: memref<2x8x16x128xf32, #tpu.memory_space<vmem>>, %arg2: memref<128x256xf32, #tpu.memory_space<vmem>>, %arg3: memref<1x8x16x256xf32, #tpu.memory_space<vmem>>, %arg4: memref<2x8x1x1xf32, #tpu.memory_space<vmem>>, %arg5: memref<2x8x16x256xf32, #tpu.memory_space<vmem>>) attributes {dimension_semantics = [#tpu.dimension_semantics<arbitrary>], iteration_bounds = array<i64: 1>, scalar_prefetch = 0 : i64, scratch_operands = 0 : i64, tpu.core_type = #tpu.core_type<tc>, window_params = [{transform_indices = @transform_0, window_bounds = array<i64: 2, 8, 16, 128>}, {pipeline_mode = #tpu.pipeline_mode<synchronous>, transform_indices = @transform_1, window_bounds = array<i64: 128, 256>}, {transform_indices = @transform_2, window_bounds = array<i64: 1, 8, 16, 256>}, {transform_indices = @transform_3, window_bounds = array<i64: 2, 8, 1, 1>}, {transform_indices = @transform_4, window_bounds = array<i64: 2, 8, 16, 256>}]} {
    %c0 = arith.constant 0 : index
    %c0_0 = arith.constant 0 : index
    %c0_1 = arith.constant 0 : index
    %c0_2 = arith.constant 0 : index
    %0 = vector.load %arg1[%c0, %c0_0, %c0_1, %c0_2] : memref<2x8x16x128xf32, #tpu.memory_space<vmem>>, vector<2x8x16x128xf32>
    %1 = vector.shape_cast %0 : vector<2x8x16x128xf32> to vector<256x128xf32>
    %c0_3 = arith.constant 0 : index
    %c0_4 = arith.constant 0 : index
    %2 = vector.load %arg2[%c0_3, %c0_4] : memref<128x256xf32, #tpu.memory_space<vmem>>, vector<128x256xf32>
    %cst = arith.constant dense<0.000000e+00> : vector<256x256xf32>
    %3 = tpu.matmul %1, %2, %cst {dimension_numbers = #tpu.dot_dimension_numbers<[1], [0], [0], [1], [0, 0, 1, 1], [], []>} : vector<256x128xf32>, vector<128x256xf32>, vector<256x256xf32> -> vector<256x256xf32>
    %4 = vector.shape_cast %3 : vector<256x256xf32> to vector<2x8x16x256xf32>
    %c0_5 = arith.constant 0 : index
    %c0_6 = arith.constant 0 : index
    %c0_7 = arith.constant 0 : index
    %c0_8 = arith.constant 0 : index
    %5 = vector.load %arg3[%c0_5, %c0_6, %c0_7, %c0_8] : memref<1x8x16x256xf32, #tpu.memory_space<vmem>>, vector<1x8x16x256xf32>
    %6 = arith.negf %5 : vector<1x8x16x256xf32>
    %7 = math.exp %6 : vector<1x8x16x256xf32>
    %cst_9 = arith.constant 1.000000e+00 : f32
    %8 = vector.broadcast %cst_9 : f32 to vector<1x8x16x256xf32>
    %9 = arith.addf %8, %7 : vector<1x8x16x256xf32>
    %10 = arith.divf %8, %9 : vector<1x8x16x256xf32>
    %cst_10 = arith.constant 2.000000e+00 : f32
    %11 = vector.broadcast %cst_10 : f32 to vector<1x8x16x256xf32>
    %12 = arith.mulf %10, %11 : vector<1x8x16x256xf32>
    %13 = vector.broadcast %12 : vector<1x8x16x256xf32> to vector<2x8x16x256xf32>
    %14 = arith.mulf %4, %13 : vector<2x8x16x256xf32>
    %cst_11 = arith.constant dense<0.000000e+00> : vector<2x8x16xf32>
    %15 = vector.multi_reduction <add>, %14, %cst_11 [3] : vector<2x8x16x256xf32> to vector<2x8x16xf32>
    %16 = vector.shape_cast %15 : vector<2x8x16xf32> to vector<2x8x16x1xf32>
    %cst_12 = arith.constant dense<0.000000e+00> : vector<2x8x1xf32>
    %17 = vector.multi_reduction <add>, %16, %cst_12 [2] : vector<2x8x16x1xf32> to vector<2x8x1xf32>
    %18 = vector.shape_cast %17 : vector<2x8x1xf32> to vector<2x8x1x1xf32>
    %cst_13 = arith.constant dense<0.000000e+00> : vector<8x1x1xf32>
    %19 = vector.multi_reduction <add>, %18, %cst_13 [0] : vector<2x8x1x1xf32> to vector<8x1x1xf32>
    %20 = vector.shape_cast %19 : vector<8x1x1xf32> to vector<1x8x1x1xf32>
    %21 = arith.mulf %14, %14 : vector<2x8x16x256xf32>
    %cst_14 = arith.constant dense<0.000000e+00> : vector<2x8x16xf32>
    %22 = vector.multi_reduction <add>, %21, %cst_14 [3] : vector<2x8x16x256xf32> to vector<2x8x16xf32>
    %23 = vector.shape_cast %22 : vector<2x8x16xf32> to vector<2x8x16x1xf32>
    %cst_15 = arith.constant dense<0.000000e+00> : vector<2x8x1xf32>
    %24 = vector.multi_reduction <add>, %23, %cst_15 [2] : vector<2x8x16x1xf32> to vector<2x8x1xf32>
    %25 = vector.shape_cast %24 : vector<2x8x1xf32> to vector<2x8x1x1xf32>
    %cst_16 = arith.constant dense<0.000000e+00> : vector<8x1x1xf32>
    %26 = vector.multi_reduction <add>, %25, %cst_16 [0] : vector<2x8x1x1xf32> to vector<8x1x1xf32>
    %27 = vector.shape_cast %26 : vector<8x1x1xf32> to vector<1x8x1x1xf32>
    %cst_17 = arith.constant 1.22070313E-4 : f32
    %28 = vector.broadcast %cst_17 : f32 to vector<1x8x1x1xf32>
    %29 = arith.mulf %20, %28 : vector<1x8x1x1xf32>
    %cst_18 = arith.constant 1.22070313E-4 : f32
    %30 = vector.broadcast %cst_18 : f32 to vector<1x8x1x1xf32>
    %31 = arith.mulf %27, %30 : vector<1x8x1x1xf32>
    %32 = arith.mulf %29, %29 : vector<1x8x1x1xf32>
    %33 = arith.subf %31, %32 : vector<1x8x1x1xf32>
    %cst_19 = arith.constant 9.99999974E-6 : f32
    %34 = vector.broadcast %cst_19 : f32 to vector<1x8x1x1xf32>
    %35 = arith.addf %33, %34 : vector<1x8x1x1xf32>
    %36 = math.rsqrt %35 : vector<1x8x1x1xf32>
    %c0_20 = arith.constant 0 : index
    %c0_21 = arith.constant 0 : index
    %c0_22 = arith.constant 0 : index
    %c0_23 = arith.constant 0 : index
    %37 = vector.load %arg4[%c0_20, %c0_21, %c0_22, %c0_23] : memref<2x8x1x1xf32, #tpu.memory_space<vmem>>, vector<2x8x1x1xf32>
    %38 = vector.extract_strided_slice %37 {offsets = [0, 0, 0, 0], sizes = [1, 8, 1, 1], strides = [1, 1, 1, 1]} : vector<2x8x1x1xf32> to vector<1x8x1x1xf32>
    %39 = vector.extract_strided_slice %37 {offsets = [1, 0, 0, 0], sizes = [1, 8, 1, 1], strides = [1, 1, 1, 1]} : vector<2x8x1x1xf32> to vector<1x8x1x1xf32>
    %40 = vector.broadcast %29 : vector<1x8x1x1xf32> to vector<2x8x16x256xf32>
    %41 = arith.subf %14, %40 : vector<2x8x16x256xf32>
    %42 = arith.mulf %36, %38 : vector<1x8x1x1xf32>
    %43 = vector.broadcast %42 : vector<1x8x1x1xf32> to vector<2x8x16x256xf32>
    %44 = arith.mulf %41, %43 : vector<2x8x16x256xf32>
    %45 = vector.broadcast %39 : vector<1x8x1x1xf32> to vector<2x8x16x256xf32>
    %46 = arith.addf %44, %45 : vector<2x8x16x256xf32>
    %c0_24 = arith.constant 0 : index
    %c0_25 = arith.constant 0 : index
    %c0_26 = arith.constant 0 : index
    %c0_27 = arith.constant 0 : index
    %47 = vector.load %arg5[%c0_24, %c0_25, %c0_26, %c0_27] : memref<2x8x16x256xf32, #tpu.memory_space<vmem>>, vector<2x8x16x256xf32>
    tpu.vector_store %arg5[%c0_24, %c0_25, %c0_26, %c0_27], %46 {strides = array<i32>} : memref<2x8x16x256xf32, #tpu.memory_space<vmem>>, vector<2x8x16x256xf32>,
    return
  }
  func.func @transform_0(%arg0: i32) -> (i32, i32, i32, i32) {
    %c0_i32 = arith.constant 0 : i32
    %c0_i32_0 = arith.constant 0 : i32
    %c0_i32_1 = arith.constant 0 : i32
    %c0_i32_2 = arith.constant 0 : i32
    return %c0_i32, %arg0, %c0_i32_0, %c0_i32_1 : i32, i32, i32, i32
  }
  func.func @transform_1(%arg0: i32) -> (i32, i32) {
    %c0_i32 = arith.constant 0 : i32
    %c0_i32_0 = arith.constant 0 : i32
    %c0_i32_1 = arith.constant 0 : i32
    return %c0_i32, %c0_i32_0 : i32, i32
  }
  func.func @transform_2(%arg0: i32) -> (i32, i32, i32, i32) {
    %c0_i32 = arith.constant 0 : i32
    %c0_i32_0 = arith.constant 0 : i32
    %c0_i32_1 = arith.constant 0 : i32
    %c0_i32_2 = arith.constant 0 : i32
    return %c0_i32, %arg0, %c0_i32_0, %c0_i32_1 : i32, i32, i32, i32
  }
  func.func @transform_3(%arg0: i32) -> (i32, i32, i32, i32) {
    %c0_i32 = arith.constant 0 : i32
    %c0_i32_0 = arith.constant 0 : i32
    %c0_i32_1 = arith.constant 0 : i32
    %c0_i32_2 = arith.constant 0 : i32
    return %c0_i32, %arg0, %c0_i32_0, %c0_i32_1 : i32, i32, i32, i32
  }
  func.func @transform_4(%arg0: i32) -> (i32, i32, i32, i32) {
    %c0_i32 = arith.constant 0 : i32
    %c0_i32_0 = arith.constant 0 : i32
    %c0_i32_1 = arith.constant 0 : i32
    %c0_i32_2 = arith.constant 0 : i32
    return %c0_i32, %arg0, %c0_i32_0, %c0_i32_1 : i32, i32, i32, i32
  }
}

</mosaic_0001>

<bundles_post_ra>
// kernel: tpu_custom_call.1
= control target key start
LH: loop header
LB: loop body
LE: loop exit
PB: predicated region body
PF: predicated region fallthrough
CT: control target
= control target key end

     0   :  { %9 = vsyncpa [#allocation3], 0  ;;  %s4044_s0 = inlined_call_operand.hbm [shape: f32[2,8,16,128], index: 0, kind: input, shape index: {}]   ;;  %s4045_s1 = inlined_call_operand.hbm [shape: f32[128,256], index: 1, kind: input, shape index: {}]   ;;  %s4046_s2 = inlined_call_operand.hbm [shape: f32[1,8,16,256], index: 2, kind: input, shape index: {}]   ;;  %s4047_s3 = inlined_call_operand.vmem [shape: f32[2,8,1,1], index: 3, kind: input, shape index: {}]   ;;  %s4048_s4 = inlined_call_operand.hbm [shape: f32[2,8,16,256], index: 4, kind: output, shape index: {}]  }
   0x1   :  { %10 = vsyncpa [#allocation6], 0  ;;  %s29_s17 = sshll.u32 %s4045_s1, 4  ;;  %s30_s17 = int_to_ptr.hbm [resolvable:$true] %s29_s17 }
   0x2   :  { %11 = vsyncpa [#allocation4], 0  ;;  %s2433_s18 = smov [#allocation5]   ;;  %s16_s22 = sshll.u32 %s4044_s0, 4  ;;  %s17_s22 = int_to_ptr.hbm [resolvable:$true] %s16_s22 }
   0x3   :  { %s31_s19 = sshll.u32 %s2433_s18, 4  ;;  %s2434_s23 = smov 256   ;;  %s32_s19 = int_to_ptr.vmem [resolvable:$true] %s31_s19 }
   0x4   :  { %s2435_s24 = smov 16   ;;  %s2436_s25 = smov [#allocation2]  }
   0x5   :  { %37 = dma.hbm_to_vmem [thread:$0]  %s30_s17, 4096, %s32_s19, [#allocation6], %s2434_s23, %s2434_s23, %s2435_s24  }
   0x6   :  { %s18_s26 = sshll.u32 %s2436_s25, 4  ;;  %s2437_s1 = smov 128   ;;  %s19_s26 = int_to_ptr.vmem [resolvable:$true] %s18_s26 }
   0x7   :  { %s2438_s27 = smov 8   ;;  %s42_s30 = sshll.u32 %s4046_s2, 4  ;;  %s43_s30 = int_to_ptr.hbm [resolvable:$true] %s42_s30 }
   0x8   :  { %24 = dma.hbm_to_vmem [thread:$0]  %s17_s22, 4096, %s19_s26, [#allocation3], %s2437_s1, %s2437_s1, %s2438_s27  }
   0x9   :  { %s2439_s5 = smov [#allocation7]  }
   0xa   :  { %s44_s0 = sshll.u32 %s2439_s5, 4  ;;  %s45_s0 = int_to_ptr.vmem [resolvable:$true] %s44_s0 }
   0xb   :  { %50 = dma.hbm_to_vmem [thread:$0]  %s43_s30, 4096, %s45_s0, [#allocation6], %s2434_s23, %s2434_s23, %s2435_s24  }
   0xc   :  { %2427 = dma.done.wait [#allocation3], 4096  }
   0xd   :  { %2428 = vsyncadd [#allocation3], 4294963200 }
   0xe   :  { %2429 = dma.done.wait [#allocation6], 8192  }
   0xf   :  { %2430 = vsyncadd [#allocation6], 4294959104  ;;  %v127_v0 = vld [vmem:[#allocation5 + $0xf0] sm:$0xff]  ;;  %v128_v1 = vld [vmem:[#allocation5 + $0xf8] sm:$0xff]  ;;  %s2089_s13 = sshll.u32 %s4048_s4, 4  ;;  %s2090_s13 = int_to_ptr.hbm [resolvable:$true] %s2089_s13 }
  0x10   :  { %v125_v2 = vld [vmem:[#allocation5 + $0xe0] sm:$0xff]  ;;  %129 = vmatpush.msra.mxu0 %v127_v0  ;;  %2135 = vmatpush.msra.mxu2 %v127_v0  ;;  %v126_v3 = vld [vmem:[#allocation5 + $0xe8] sm:$0xff]  ;;  %v123_v4 = vld [vmem:[#allocation5 + $0xd0] sm:$0xff] }
  0x11   :  { %242 = vmatpush.msra.mxu1 %v128_v1  ;;  %2151 = vmatpush.msra.mxu3 %v128_v1  ;;  %v124_v5 = vld [vmem:[#allocation5 + $0xd8] sm:$0xff]  ;;  %v121_v6 = vld [vmem:[#allocation5 + $0xc0] sm:$0xff]  ;;  %v122_v7 = vld [vmem:[#allocation5 + $0xc8] sm:$0xff] }
  0x12   :  { %130 = vmatpush.msra.mxu0 %v125_v2  ;;  %2136 = vmatpush.msra.mxu2 %v125_v2  ;;  %v119_v8 = vld [vmem:[#allocation5 + $0xb0] sm:$0xff]  ;;  %v120_v9 = vld [vmem:[#allocation5 + $0xb8] sm:$0xff]  ;;  %v117_v10 = vld [vmem:[#allocation5 + $0xa0] sm:$0xff] }
  0x13   :  { %243 = vmatpush.msra.mxu1 %v126_v3  ;;  %2152 = vmatpush.msra.mxu3 %v126_v3  ;;  %v118_v11 = vld [vmem:[#allocation5 + $0xa8] sm:$0xff]  ;;  %v115_v12 = vld [vmem:[#allocation5 + $0x90] sm:$0xff]  ;;  %v116_v13 = vld [vmem:[#allocation5 + $0x98] sm:$0xff] }
  0x14   :  { %131 = vmatpush.msra.mxu0 %v123_v4  ;;  %2137 = vmatpush.msra.mxu2 %v123_v4  ;;  %v113_v14 = vld [vmem:[#allocation5 + $0x80] sm:$0xff]  ;;  %v114_v15 = vld [vmem:[#allocation5 + $0x88] sm:$0xff]  ;;  %v111_v16 = vld [vmem:[#allocation5 + $0x70] sm:$0xff] }
  0x15   :  { %244 = vmatpush.msra.mxu1 %v124_v5  ;;  %2153 = vmatpush.msra.mxu3 %v124_v5  ;;  %v112_v17 = vld [vmem:[#allocation5 + $0x78] sm:$0xff]  ;;  %v109_v18 = vld [vmem:[#allocation5 + $0x60] sm:$0xff]  ;;  %v110_v19 = vld [vmem:[#allocation5 + $0x68] sm:$0xff] }
  0x16   :  { %132 = vmatpush.msra.mxu0 %v121_v6  ;;  %2138 = vmatpush.msra.mxu2 %v121_v6  ;;  %v107_v20 = vld [vmem:[#allocation5 + $0x50] sm:$0xff]  ;;  %v108_v21 = vld [vmem:[#allocation5 + $0x58] sm:$0xff]  ;;  %v105_v22 = vld [vmem:[#allocation5 + $0x40] sm:$0xff] }
  0x17   :  { %245 = vmatpush.msra.mxu1 %v122_v7  ;;  %2154 = vmatpush.msra.mxu3 %v122_v7  ;;  %v106_v23 = vld [vmem:[#allocation5 + $0x48] sm:$0xff]  ;;  %v103_v24 = vld [vmem:[#allocation5 + $0x30] sm:$0xff]  ;;  %v104_v25 = vld [vmem:[#allocation5 + $0x38] sm:$0xff] }
  0x18   :  { %133 = vmatpush.msra.mxu0 %v119_v8  ;;  %2139 = vmatpush.msra.mxu2 %v119_v8  ;;  %v101_v26 = vld [vmem:[#allocation5 + $0x20] sm:$0xff]  ;;  %v102_v27 = vld [vmem:[#allocation5 + $0x28] sm:$0xff]  ;;  %v99_v28 = vld [vmem:[#allocation5 + $0x10] sm:$0xff] }
  0x19   :  { %246 = vmatpush.msra.mxu1 %v120_v9  ;;  %2155 = vmatpush.msra.mxu3 %v120_v9  ;;  %v100_v29 = vld [vmem:[#allocation5 + $0x18] sm:$0xff]  ;;  %v97_v30 = vld [vmem:[#allocation5] sm:$0xff]  ;;  %v98_v31 = vld [vmem:[#allocation5 + $0x8] sm:$0xff] }
  0x1a   :  { %134 = vmatpush.msra.mxu0 %v117_v10  ;;  %2140 = vmatpush.msra.mxu2 %v117_v10  ;;  %v65_v32 = vld [vmem:[#allocation2] sm:$0xff]  ;;  %v66_v34 = vld [vmem:[#allocation2 + $0x8] sm:$0xff]  ;;  %v67_v36 = vld [vmem:[#allocation2 + $0x10] sm:$0xff] }
  0x1b   :  { %247 = vmatpush.msra.mxu1 %v118_v11  ;;  %2156 = vmatpush.msra.mxu3 %v118_v11  ;;  %v81_v33 = vld [vmem:[#allocation2 + $0x80] sm:$0xff]  ;;  %v82_v35 = vld [vmem:[#allocation2 + $0x88] sm:$0xff]  ;;  %v83_v37 = vld [vmem:[#allocation2 + $0x90] sm:$0xff] }
  0x1c   :  { %135 = vmatpush.msra.mxu0 %v115_v12  ;;  %2141 = vmatpush.msra.mxu2 %v115_v12  ;;  %v68_v38 = vld [vmem:[#allocation2 + $0x18] sm:$0xff]  ;;  %v69_v40 = vld [vmem:[#allocation2 + $0x20] sm:$0xff]  ;;  %v86_v42 = vld [vmem:[#allocation2 + $0xa8] sm:$0xff] }
  0x1d   :  { %248 = vmatpush.msra.mxu1 %v116_v13  ;;  %2157 = vmatpush.msra.mxu3 %v116_v13  ;;  %v84_v39 = vld [vmem:[#allocation2 + $0x98] sm:$0xff]  ;;  %v85_v41 = vld [vmem:[#allocation2 + $0xa0] sm:$0xff]  ;;  %v70_v43 = vld [vmem:[#allocation2 + $0x28] sm:$0xff] }
  0x1e   :  { %136 = vmatpush.msra.mxu0 %v113_v14  ;;  %2142 = vmatpush.msra.mxu2 %v113_v14  ;;  %v71_v44 = vld [vmem:[#allocation2 + $0x30] sm:$0xff]  ;;  %v88_v46 = vld [vmem:[#allocation2 + $0xb8] sm:$0xff]  ;;  %v89_v48 = vld [vmem:[#allocation2 + $0xc0] sm:$0xff] }
  0x1f   :  { %249 = vmatpush.msra.mxu1 %v114_v15  ;;  %2158 = vmatpush.msra.mxu3 %v114_v15  ;;  %v87_v45 = vld [vmem:[#allocation2 + $0xb0] sm:$0xff]  ;;  %v72_v47 = vld [vmem:[#allocation2 + $0x38] sm:$0xff]  ;;  %v73_v49 = vld [vmem:[#allocation2 + $0x40] sm:$0xff] }
  0x20   :  { %137 = vmatpush.msra.mxu0 %v111_v16  ;;  %2143 = vmatpush.msra.mxu2 %v111_v16  ;;  %v355_v50 = vld [vmem:[#allocation7] sm:$0xff]  ;;  %v356_v51 = vld [vmem:[#allocation7 + $0x8] sm:$0xff]  ;;  %v357_v56 = vld [vmem:[#allocation7 + $0x10] sm:$0xff] }
  0x21   :  { %250 = vmatpush.msra.mxu1 %v112_v17  ;;  %2159 = vmatpush.msra.mxu3 %v112_v17  ;;  %v2103_v52 = vmul.f32 -1.442695, %v355_v50  ;;  %v2104_v53 = vmul.f32 -1.442695, %v356_v51  ;;  %v74_v54 = vld [vmem:[#allocation2 + $0x48] sm:$0xff]  ;;  %v358_v57 = vld [vmem:[#allocation7 + $0x18] sm:$0xff] }
  0x22   :  { %138 = vmatpush.msra.mxu0 %v109_v18  ;;  %2144 = vmatpush.msra.mxu2 %v109_v18  ;;  %v90_v55 = vld [vmem:[#allocation2 + $0xc8] sm:$0xff]  ;;  %v2105_v58 = vmul.f32 -1.442695, %v357_v56  ;;  %v2106_v61 = vmul.f32 -1.442695, %v358_v57  ;;  %v91_v62 = vld [vmem:[#allocation2 + $0xd0] sm:$0xff] }
  0x23   :  { %251 = vmatpush.msra.mxu1 %v110_v19  ;;  %2160 = vmatpush.msra.mxu3 %v110_v19  ;;  %2187 = vpow2.f32 %v2103_v52  ;;  %v75_v63 = vld [vmem:[#allocation2 + $0x50] sm:$0xff]  ;;  %v359_v2 = vld [vmem:[#allocation7 + $0x20] sm:$0xff]  ;;  %v360_v3 = vld [vmem:[#allocation7 + $0x28] sm:$0xff] }
  0x24   :  { %139 = vmatpush.msra.mxu0 %v107_v20  ;;  %2145 = vmatpush.msra.mxu2 %v107_v20  ;;  %2189 = vpow2.f32 %v2104_v53  ;;  %v2107_v4 = vmul.f32 -1.442695, %v359_v2  ;;  %v2108_v6 = vmul.f32 -1.442695, %v360_v3  ;;  %v92_v8 = vld [vmem:[#allocation2 + $0xd8] sm:$0xff]  ;;  %v77_v20 = vld [vmem:[#allocation2 + $0x60] sm:$0xff] }
  0x25   :  { %252 = vmatpush.msra.mxu1 %v108_v21  ;;  %2161 = vmatpush.msra.mxu3 %v108_v21  ;;  %2191 = vpow2.f32 %v2105_v58  ;;  %v76_v9 = vld [vmem:[#allocation2 + $0x58] sm:$0xff]  ;;  %v93_v21 = vld [vmem:[#allocation2 + $0xe0] sm:$0xff]  ;;  %v364_v56 = vld [vmem:[#allocation7 + $0x48] sm:$0xff] }
  0x26   :  { %140 = vmatpush.msra.mxu0 %v105_v22  ;;  %2146 = vmatpush.msra.mxu2 %v105_v22  ;;  %2193 = vpow2.f32 %v2106_v61  ;;  %v78_v2 = vld [vmem:[#allocation2 + $0x68] sm:$0xff]  ;;  %v2112_v3 = vmul.f32 -1.442695, %v364_v56 }
  0x27   :  { %253 = vmatpush.msra.mxu1 %v106_v23  ;;  %2162 = vmatpush.msra.mxu3 %v106_v23 }
  0x28   :  { %141 = vmatpush.msra.mxu0 %v103_v24  ;;  %2147 = vmatpush.msra.mxu2 %v103_v24 }
  0x29   :  { %254 = vmatpush.msra.mxu1 %v104_v25  ;;  %2163 = vmatpush.msra.mxu3 %v104_v25  ;;  %v2188_v59 = vpop.eup %2187  ;;  %v361_v25 = vld [vmem:[#allocation7 + $0x30] sm:$0xff] }
  0x2a   :  { %142 = vmatpush.msra.mxu0 %v101_v26  ;;  %2148 = vmatpush.msra.mxu2 %v101_v26  ;;  %v2190_v60 = vpop.eup %2189  ;;  %v2482_v0 = vadd.f32 1.0, %v2188_v59  ;;  %v362_v26 = vld [vmem:[#allocation7 + $0x38] sm:$0xff] }
  0x2b   :  { %255 = vmatpush.msra.mxu1 %v102_v27  ;;  %2164 = vmatpush.msra.mxu3 %v102_v27  ;;  %v2484_v1 = vadd.f32 1.0, %v2190_v60  ;;  %v2192_v5 = vpop.eup %2191 }
  0x2c   :  { %143 = vmatpush.msra.mxu0 %v99_v28  ;;  %2149 = vmatpush.msra.mxu2 %v99_v28  ;;  %2195 = vrcp.f32 %v2482_v0  ;;  %v2194_v7 = vpop.eup %2193  ;;  %v2488_v10 = vadd.f32 1.0, %v2192_v5  ;;  %vm520_vm0 = vweird.f32 %v2482_v0 }
  0x2d   :  { %256 = vmatpush.msra.mxu1 %v100_v29  ;;  %2165 = vmatpush.msra.mxu3 %v100_v29  ;;  %2197 = vrcp.f32 %v2484_v1  ;;  %v2494_v13 = vadd.f32 1.0, %v2194_v7  ;;  %vm535_vm2 = vweird.f32 %v2484_v1 }
  0x2e   :  { %144 = vmatpush.msra.mxu0 %v97_v30  ;;  %2150 = vmatpush.msra.mxu2 %v97_v30  ;;  %2199 = vpow2.f32 %v2107_v4  ;;  %v556_v58 = vand.u32 2147483648, %v2488_v10  ;;  %vm550_vm8 = vweird.f32 %v2488_v10 }
  0x2f   :  { %257 = vmatpush.msra.mxu1 %v98_v31  ;;  %2166 = vmatpush.msra.mxu3 %v98_v31  ;;  %2201 = vpow2.f32 %v2108_v6  ;;  %v2109_v31 = vmul.f32 -1.442695, %v361_v25  ;;  %vm565_vm10 = vweird.f32 %v2494_v13  ;;  %v569_v6 = vand.u32 2147483647, %v2494_v13 }
  0x30   :  { %145 = vmatmul.f32.vlgmr.msra.gmra.mxu0 %v65_v32  ;;  %193 = vmatmul.f32.vlgmr.msra.gmra.mxu2 %v81_v33  ;;  %2203 = vrcp.f32 %v2488_v10 }
  0x31   :  { %258 = vmatmul.f32.vlgmr.msra.gmra.mxu1 %v65_v32  ;;  %306 = vmatmul.f32.vlgmr.msra.gmra.mxu3 %v81_v33  ;;  %2205 = vrcp.f32 %v2494_v13  ;;  %v2110_v32 = vmul.f32 -1.442695, %v362_v26  ;;  %vm2601_vm15 = vcmp.eq.f32.partialorder %v569_v6, 8.507059e+37 }
  0x32   :  { %v2490_v11 = vpop.eup %2195 }
  0x33   :  { %v2492_v12 = vpop.eup %2197  ;;  %v516_v14 = vmul.f32 %v2490_v11, %v2482_v0  ;;  %vm521_vm1 = vweird.f32 %v2490_v11 }
  0x34   :  { %v531_v15 = vmul.f32 %v2492_v12, %v2484_v1  ;;  %v2200_v16 = vpop.eup %2199  ;;  %vm536_vm3 = vweird.f32 %v2492_v12  ;;  %vm2525_vm4 = vmor %vm520_vm0, %vm521_vm1 }
  0x35   :  { %v2202_v17 = vpop.eup %2201  ;;  %v517_v18 = vsub.f32 1.0, %v516_v14  ;;  %v2502_v22 = vadd.f32 1.0, %v2200_v16  ;;  %vm2532_vm5 = vmor %vm535_vm2, %vm536_vm3 }
  0x36   :  { %v532_v19 = vsub.f32 1.0, %v531_v15  ;;  %v2504_v23 = vpop.eup %2203  ;;  %v2506_v24 = vadd.f32 1.0, %v2202_v17  ;;  %v557_v15 = vor.u32 1.1754944e-38, %v556_v58  ;;  %v80_v58 = vld [vmem:[#allocation2 + $0x78] sm:$0xff] }
  0x37   :  { %v2508_v27 = vpop.eup %2205  ;;  %v518_v28 = vmul.f32 %v2490_v11, %v517_v18  ;;  %v546_v30 = vmul.f32 %v2504_v23, %v2488_v10  ;;  %2207 = vrcp.f32 %v2502_v22  ;;  %vm551_vm9 = vweird.f32 %v2504_v23 }
  0x38   :  { %148 = vmatmul.f32.gmra.mxu0 %v66_v34  ;;  %196 = vmatmul.f32.gmra.mxu2 %v82_v35  ;;  %v533_v29 = vmul.f32 %v2492_v12, %v532_v19  ;;  %2209 = vrcp.f32 %v2506_v24  ;;  %v561_v33 = vmul.f32 %v2508_v27, %v2494_v13  ;;  %vm566_vm11 = vweird.f32 %v2508_v27  ;;  %vm2579_vm12 = vmor %vm550_vm8, %vm551_vm9 }
  0x39   :  { %261 = vmatmul.f32.gmra.mxu1 %v66_v34  ;;  %309 = vmatmul.f32.gmra.mxu3 %v82_v35  ;;  %2211 = vpow2.f32 %v2109_v31  ;;  %v519_v34 = vadd.f32 %v2490_v11, %v518_v28  ;;  %v524_v35 = vand.u32 2147483647, %v2482_v0  ;;  %vm2586_vm13 = vmor %vm565_vm10, %vm566_vm11  ;;  %v586_v28 = vand.u32 2147483648, %v2502_v22 }
  0x3a   :  { %2213 = vpow2.f32 %v2110_v32  ;;  %vm580_vm0 = vweird.f32 %v2502_v22  ;;  %v584_v32 = vand.u32 2147483647, %v2502_v22 }
  0x3b   :  { %vm2543_vm6 = vcmp.eq.f32.partialorder %v524_v35, 8.507059e+37  ;;  %v96_v35 = vld [vmem:[#allocation2 + $0xf8] sm:$0xff] }
  0x3c   :  { %vm2641_vm3 = vcmp.eq.f32.partialorder %v584_v32, 8.507059e+37 }
  0x40   :  { %151 = vmatmul.f32.gmra.mxu0 %v67_v36  ;;  %199 = vmatmul.f32.gmra.mxu2 %v83_v37 }
  0x41   :  { %264 = vmatmul.f32.gmra.mxu1 %v67_v36  ;;  %312 = vmatmul.f32.gmra.mxu3 %v83_v37  ;;  %v526_v36 = vand.u32 2147483648, %v2482_v0 }
  0x43   :  { %v527_v50 = vor.u32 1.1754944e-38, %v526_v36 }
  0x48   :  { %154 = vmatmul.f32.gmra.mxu0 %v68_v38  ;;  %202 = vmatmul.f32.gmra.mxu2 %v84_v39 }
  0x49   :  { %267 = vmatmul.f32.gmra.mxu1 %v68_v38  ;;  %315 = vmatmul.f32.gmra.mxu3 %v84_v39  ;;  %v534_v38 = vadd.f32 %v2492_v12, %v533_v29  ;;  %v539_v39 = vand.u32 2147483647, %v2484_v1  ;;  %v601_v29 = vand.u32 2147483648, %v2506_v24 }
  0x4b   :  { %v538_v52 = vsel %vm2532_vm5, %v2492_v12, %v534_v38  ;;  %vm2550_vm7 = vcmp.eq.f32.partialorder %v539_v39, 8.507059e+37 }
  0x50   :  { %157 = vmatmul.f32.gmra.mxu0 %v69_v40  ;;  %205 = vmatmul.f32.gmra.mxu2 %v85_v41 }
  0x51   :  { %270 = vmatmul.f32.gmra.mxu1 %v69_v40  ;;  %318 = vmatmul.f32.gmra.mxu3 %v85_v41  ;;  %v541_v40 = vand.u32 2147483648, %v2484_v1  ;;  %v547_v41 = vsub.f32 1.0, %v546_v30  ;;  %v554_v1 = vand.u32 2147483647, %v2488_v10  ;;  %v79_v30 = vld [vmem:[#allocation2 + $0x70] sm:$0xff] }
  0x53   :  { %vm2592_vm14 = vcmp.eq.f32.partialorder %v554_v1, 8.507059e+37 }
  0x58   :  { %208 = vmatmul.f32.gmra.mxu2 %v86_v42  ;;  %160 = vmatmul.f32.gmra.mxu0 %v70_v43 }
  0x59   :  { %321 = vmatmul.f32.gmra.mxu3 %v86_v42  ;;  %273 = vmatmul.f32.gmra.mxu1 %v70_v43  ;;  %v94_v42 = vld [vmem:[#allocation2 + $0xe8] sm:$0xff] }
  0x60   :  { %163 = vmatmul.f32.gmra.mxu0 %v71_v44  ;;  %211 = vmatmul.f32.gmra.mxu2 %v87_v45 }
  0x61   :  { %276 = vmatmul.f32.gmra.mxu1 %v71_v44  ;;  %324 = vmatmul.f32.gmra.mxu3 %v87_v45  ;;  %v2536_v44 = vpop.eup %2207  ;;  %v562_v45 = vsub.f32 1.0, %v561_v33 }
  0x62   :  { %v576_v59 = vmul.f32 %v2536_v44, %v2502_v22  ;;  %vm581_vm1 = vweird.f32 %v2536_v44 }
  0x63   :  { %vm2637_vm2 = vmor %vm580_vm0, %vm581_vm1 }
  0x64   :  { %v577_v7 = vsub.f32 1.0, %v576_v59 }
  0x68   :  { %214 = vmatmul.f32.gmra.mxu2 %v88_v46  ;;  %166 = vmatmul.f32.gmra.mxu0 %v72_v47 }
  0x69   :  { %327 = vmatmul.f32.gmra.mxu3 %v88_v46  ;;  %279 = vmatmul.f32.gmra.mxu1 %v72_v47  ;;  %v363_v46 = vld [vmem:[#allocation7 + $0x40] sm:$0xff]  ;;  %v2538_v47 = vpop.eup %2209 }
  0x6a   :  { %v2212_v51 = vpop.eup %2211  ;;  %v2111_v61 = vmul.f32 -1.442695, %v363_v46  ;;  %v591_v4 = vmul.f32 %v2538_v47, %v2506_v24  ;;  %vm596_vm5 = vweird.f32 %v2538_v47 }
  0x6b   :  { %v2214_v57 = vpop.eup %2213  ;;  %v2558_v60 = vadd.f32 1.0, %v2212_v51 }
  0x6c   :  { %v2563_v0 = vadd.f32 1.0, %v2214_v57  ;;  %v592_v16 = vsub.f32 1.0, %v591_v4 }
  0x6d   :  { %2215 = vrcp.f32 %v2558_v60  ;;  %v616_v57 = vand.u32 2147483648, %v2558_v60  ;;  %vm610_vm8 = vweird.f32 %v2558_v60 }
  0x6e   :  { %2217 = vrcp.f32 %v2563_v0  ;;  %vm625_vm10 = vweird.f32 %v2563_v0  ;;  %v629_v6 = vand.u32 2147483647, %v2563_v0 }
  0x6f   :  { %2219 = vpow2.f32 %v2111_v61 }
  0x70   :  { %217 = vmatmul.f32.gmra.mxu2 %v89_v48  ;;  %169 = vmatmul.f32.gmra.mxu0 %v73_v49  ;;  %2221 = vpow2.f32 %v2112_v3 }
  0x71   :  { %330 = vmatmul.f32.gmra.mxu3 %v89_v48  ;;  %282 = vmatmul.f32.gmra.mxu1 %v73_v49  ;;  %v523_v48 = vsel %vm2525_vm4, %v2490_v11, %v519_v34  ;;  %v95_v11 = vld [vmem:[#allocation2 + $0xf0] sm:$0xff]  ;;  %vm595_vm4 = vweird.f32 %v2506_v24 }
  0x72   :  { %v528_v12 = vsel %vm2543_vm6, %v527_v50, %v523_v48  ;;  %v365_v49 = vld [vmem:[#allocation7 + $0x50] sm:$0xff]  ;;  %v366_v50 = vld [vmem:[#allocation7 + $0x58] sm:$0xff] }
  0x73   :  { %v2596_v17 = vpop.eup %2215  ;;  %v2620_v34 = vmul.f32 2.0, %v528_v12  ;;  %v2114_v59 = vmul.f32 -1.442695, %v366_v50 }
  0x74   :  { %v2606_v25 = vpop.eup %2217  ;;  %vm611_vm9 = vweird.f32 %v2596_v17 }
  0x75   :  { %v2220_v31 = vpop.eup %2219  ;;  %v621_v33 = vmul.f32 %v2606_v25, %v2563_v0  ;;  %vm626_vm11 = vweird.f32 %v2606_v25 }
  0x76   :  { %v2623_v36 = vadd.f32 1.0, %v2220_v31  ;;  %v2222_v37 = vpop.eup %2221 }
  0x77   :  { %v622_v48 = vsub.f32 1.0, %v621_v33  ;;  %v2649_v53 = vadd.f32 1.0, %v2222_v37 }
  0x78   :  { %172 = vmatmul.f32.gmra.mxu0 %v74_v54  ;;  %220 = vmatmul.f32.gmra.mxu2 %v90_v55  ;;  %2223 = vrcp.f32 %v2623_v36  ;;  %vm640_vm0 = vweird.f32 %v2623_v36 }
  0x79   :  { %285 = vmatmul.f32.gmra.mxu1 %v74_v54  ;;  %333 = vmatmul.f32.gmra.mxu3 %v90_v55  ;;  %v542_v54 = vor.u32 1.1754944e-38, %v541_v40  ;;  %v548_v55 = vmul.f32 %v2504_v23, %v547_v41  ;;  %v599_v41 = vand.u32 2147483647, %v2506_v24  ;;  %2225 = vrcp.f32 %v2649_v53 }
  0x7a   :  { %v614_v24 = vand.u32 2147483647, %v2558_v60 }
  0x7b   :  { %v549_v5 = vadd.f32 %v2504_v23, %v548_v55  ;;  %v543_v10 = vsel %vm2550_vm7, %v542_v54, %v538_v52  ;;  %v602_v52 = vor.u32 1.1754944e-38, %v601_v29  ;;  %v2113_v54 = vmul.f32 -1.442695, %v365_v49  ;;  %vm2661_vm7 = vmor %vm595_vm4, %vm596_vm5 }
  0x7c   :  { %v2625_v38 = vmul.f32 2.0, %v543_v10  ;;  %vm2654_vm6 = vcmp.eq.f32.partialorder %v599_v41, 8.507059e+37 }
  0x7d   :  { %v553_v18 = vsel %vm2579_vm12, %v2504_v23, %v549_v5  ;;  %v606_v23 = vmul.f32 %v2596_v17, %v2558_v60  ;;  %2227 = vpow2.f32 %v2113_v54  ;;  %vm2697_vm12 = vmor %vm610_vm8, %vm611_vm9 }
  0x7e   :  { %v558_v39 = vsel %vm2592_vm14, %v557_v15, %v553_v18  ;;  %2229 = vpow2.f32 %v2114_v59  ;;  %vm2718_vm14 = vcmp.eq.f32.partialorder %v614_v24, 8.507059e+37  ;;  %v368_v59 = vld [vmem:[#allocation7 + $0x68] sm:$0xff] }
  0x7f   :  { %v607_v46 = vsub.f32 1.0, %v606_v23  ;;  %v997_v10 = vmul.f32 2.0, %v558_v39 }
  0x80   :  { %223 = vmatmul.f32.gmra.mxu2 %v91_v62  ;;  %175 = vmatmul.f32.gmra.mxu0 %v75_v63 }
  0x81   :  { %336 = vmatmul.f32.gmra.mxu3 %v91_v62  ;;  %288 = vmatmul.f32.gmra.mxu1 %v75_v63  ;;  %v563_v62 = vmul.f32 %v2508_v27, %v562_v45  ;;  %v571_v63 = vand.u32 2147483648, %v2494_v13  ;;  %v587_v45 = vor.u32 1.1754944e-38, %v586_v28 }
  0x88   :  { %226 = vmatmul.f32.gmra.mxu2 %v92_v8  ;;  %178 = vmatmul.f32.gmra.mxu0 %v76_v9 }
  0x89   :  { %339 = vmatmul.f32.gmra.mxu3 %v92_v8  ;;  %291 = vmatmul.f32.gmra.mxu1 %v76_v9  ;;  %v564_v9 = vadd.f32 %v2508_v27, %v563_v62  ;;  %v2686_v8 = vpop.eup %2223 }
  0x8a   :  { %v636_v60 = vmul.f32 %v2686_v8, %v2623_v36  ;;  %v2714_v18 = vpop.eup %2225  ;;  %vm641_vm1 = vweird.f32 %v2686_v8 }
  0x8b   :  { %v568_v26 = vsel %vm2586_vm13, %v2508_v27, %v564_v9  ;;  %v593_v27 = vmul.f32 %v2538_v47, %v592_v16  ;;  %vm2708_vm13 = vmor %vm625_vm10, %vm626_vm11  ;;  %v2228_v28 = vpop.eup %2227  ;;  %v651_v32 = vmul.f32 %v2714_v18, %v2649_v53  ;;  %v661_v16 = vand.u32 2147483648, %v2649_v53 }
  0x8c   :  { %v2230_v33 = vpop.eup %2229  ;;  %v637_v39 = vsub.f32 1.0, %v636_v60  ;;  %vm2791_vm4 = vmor %vm640_vm0, %vm641_vm1 }
  0x8d   :  { %v594_v22 = vadd.f32 %v2538_v47, %v593_v27  ;;  %v2756_v50 = vadd.f32 1.0, %v2230_v33 }
  0x8f   :  { %v598_v5 = vsel %vm2661_vm7, %v2538_v47, %v594_v22  ;;  %v646_v22 = vand.u32 2147483648, %v2623_v36  ;;  %v2116_v47 = vmul.f32 -1.442695, %v368_v59 }
  0x90   :  { %181 = vmatmul.f32.gmra.mxu0 %v77_v20  ;;  %229 = vmatmul.f32.gmra.mxu2 %v93_v21 }
  0x91   :  { %294 = vmatmul.f32.gmra.mxu1 %v77_v20  ;;  %342 = vmatmul.f32.gmra.mxu3 %v93_v21  ;;  %v572_v20 = vor.u32 1.1754944e-38, %v571_v63  ;;  %v578_v21 = vmul.f32 %v2536_v44, %v577_v7  ;;  %v608_v63 = vmul.f32 %v2596_v17, %v607_v46  ;;  %v631_v7 = vand.u32 2147483648, %v2563_v0 }
  0x92   :  { %v617_v0 = vor.u32 1.1754944e-38, %v616_v57  ;;  %v2748_v46 = vadd.f32 1.0, %v2228_v28  ;;  %v644_v57 = vand.u32 2147483647, %v2623_v36 }
  0x93   :  { %v579_v40 = vadd.f32 %v2536_v44, %v578_v21  ;;  %v609_v12 = vadd.f32 %v2596_v17, %v608_v63  ;;  %v603_v21 = vsel %vm2654_vm6, %v602_v52, %v598_v5  ;;  %v632_v31 = vor.u32 1.1754944e-38, %v631_v7 }
  0x94   :  { %v638_v52 = vmul.f32 %v2686_v8, %v637_v39  ;;  %2231 = vrcp.f32 %v2748_v46  ;;  %vm2818_vm6 = vcmp.eq.f32.partialorder %v644_v57, 8.507059e+37  ;;  %vm670_vm8 = vweird.f32 %v2748_v46 }
  0x95   :  { %v583_v55 = vsel %vm2637_vm2, %v2536_v44, %v579_v40  ;;  %v623_v44 = vmul.f32 %v2606_v25, %v622_v48  ;;  %v367_v48 = vld [vmem:[#allocation7 + $0x60] sm:$0xff]  ;;  %2233 = vrcp.f32 %v2756_v50  ;;  %vm655_vm2 = vweird.f32 %v2649_v53 }
  0x96   :  { %v588_v15 = vsel %vm2641_vm3, %v587_v45, %v583_v55  ;;  %v2115_v55 = vmul.f32 -1.442695, %v367_v48  ;;  %vm656_vm3 = vweird.f32 %v2714_v18  ;;  %v639_v5 = vadd.f32 %v2686_v8, %v638_v52  ;;  %v369_v52 = vld [vmem:[#allocation7 + $0x70] sm:$0xff] }
  0x97   :  { %v624_v14 = vadd.f32 %v2606_v25, %v623_v44  ;;  %v2746_v45 = vmul.f32 2.0, %v588_v15  ;;  %vm2809_vm5 = vmor %vm655_vm2, %vm656_vm3 }
  0x98   :  { %232 = vmatmul.f32.gmra.mxu2 %v94_v42  ;;  %184 = vmatmul.f32.gmra.mxu0 %v78_v2  ;;  %2235 = vpow2.f32 %v2115_v55 }
  0x99   :  { %345 = vmatmul.f32.gmra.mxu3 %v94_v42  ;;  %297 = vmatmul.f32.gmra.mxu1 %v78_v2  ;;  %v573_v42 = vsel %vm2601_vm15, %v572_v20, %v568_v26  ;;  %vm2725_vm15 = vcmp.eq.f32.partialorder %v629_v6, 8.507059e+37  ;;  %v628_v37 = vsel %vm2708_vm13, %v2606_v25, %v624_v14  ;;  %2237 = vpow2.f32 %v2116_v47  ;;  %v370_v47 = vld [vmem:[#allocation7 + $0x78] sm:$0xff] }
  0x9a   :  { %v998_v13 = vmul.f32 2.0, %v573_v42  ;;  %v652_v42 = vsub.f32 1.0, %v651_v32  ;;  %v633_v49 = vsel %vm2725_vm15, %v632_v31, %v628_v37  ;;  %v2796_v14 = vpop.eup %2231  ;;  %v662_v37 = vor.u32 1.1754944e-38, %v661_v16 }
  0x9b   :  { %v2814_v60 = vpop.eup %2233  ;;  %v666_v26 = vmul.f32 %v2796_v14, %v2748_v46  ;;  %vm671_vm9 = vweird.f32 %v2796_v14 }
  0x9c   :  { %v653_v54 = vmul.f32 %v2714_v18, %v652_v42  ;;  %v681_v39 = vmul.f32 %v2814_v60, %v2756_v50  ;;  %vm2875_vm10 = vmor %vm670_vm8, %vm671_vm9  ;;  %vm686_vm13 = vweird.f32 %v2814_v60 }
  0x9d   :  { %v667_v32 = vsub.f32 1.0, %v666_v26 }
  0x9e   :  { %v2236_v33 = vpop.eup %2235 }
  0x9f   :  { %v668_v42 = vmul.f32 %v2796_v14, %v667_v32  ;;  %v371_v32 = vld [vmem:[#allocation7 + $0x80] sm:$0xff] }
  0xa0   :  { %235 = vmatmul.f32.gmra.mxu2 %v95_v11  ;;  %187 = vmatmul.f32.gmra.mxu0 %v79_v30 }
  0xa1   :  { %348 = vmatmul.f32.gmra.mxu3 %v95_v11  ;;  %300 = vmatmul.f32.gmra.mxu1 %v79_v30 }
  0xa8   :  { %238 = vmatmul.f32.gmra.mxu2 %v96_v35  ;;  %190 = vmatmul.f32.gmra.mxu0 %v80_v58 }
  0xa9   :  { %351 = vmatmul.f32.gmra.mxu3 %v96_v35  ;;  %303 = vmatmul.f32.gmra.mxu1 %v80_v58  ;;  %v659_v58 = vand.u32 2147483647, %v2649_v53  ;;  %v643_v53 = vsel %vm2791_vm4, %v2686_v8, %v639_v5  ;;  %v2117_v5 = vmul.f32 -1.442695, %v369_v52 }
  0xab   :  { %vm2829_vm7 = vcmp.eq.f32.partialorder %v659_v58, 8.507059e+37  ;;  %v669_v58 = vadd.f32 %v2796_v14, %v668_v42 }
  0xad   :  { %v146_v61 = vpop.f32.mrf.mxu0  ;;  %v673_v16 = vsel %vm2875_vm10, %v2796_v14, %v669_v58 }
  0xae   :  { %v2670_v1 = vmul.f32 %v2620_v34, %v146_v61  ;;  %v259_v2 = vpop.f32.mrf.mxu1 }
  0xaf   :  { %v2675_v3 = vmul.f32 %v2625_v38, %v259_v2 }
  0xb0   :  { %v1307_v4 = vmul.f32 %v2670_v1, %v2670_v1 }
  0xb1   :  { %v1091_v9 = vadd.f32 %v2675_v3, %v2670_v1  ;;  %v1308_v11 = vmul.f32 %v2675_v3, %v2675_v3 }
  0xb3   :  { %1092 = vadd.xlane.f32.xlu0 %v1091_v9  ;;  %v194_v19 = vpop.f32.mrf.mxu2  ;;  %v1371_v20 = vadd.f32 %v1308_v11, %v1307_v4 }
  0xb4   :  { %v2723_v29 = vmul.f32 %v2620_v34, %v194_v19  ;;  %v307_v30 = vpop.f32.mrf.mxu3  ;;  %v613_v34 = vsel %vm2697_vm12, %v2596_v17, %v609_v12  ;;  %v2750_v17 = vmul.f32 2.0, %v603_v21  ;;  %v654_v12 = vadd.f32 %v2714_v18, %v653_v54 }
  0xb5   :  { %v2732_v27 = vmul.f32 %v2625_v38, %v307_v30  ;;  %1372 = vadd.xlane.f32.xlu2 %v1371_v20  ;;  %v149_v35 = vpop.f32.mrf.mxu0  ;;  %v618_v25 = vsel %vm2718_vm14, %v617_v0, %v613_v34  ;;  %v2816_v19 = vmul.f32 2.0, %v633_v49  ;;  %v647_v21 = vor.u32 1.1754944e-38, %v646_v22 }
  0xb6   :  { %v2740_v40 = vmul.f32 %v997_v10, %v149_v35  ;;  %v262_v41 = vpop.f32.mrf.mxu1  ;;  %v1339_v63 = vmul.f32 %v2723_v29, %v2723_v29  ;;  %v2803_v15 = vmul.f32 2.0, %v618_v25  ;;  %v658_v31 = vsel %vm2809_vm5, %v2714_v18, %v654_v12 }
  0xb7   :  { %v2742_v43 = vmul.f32 %v998_v13, %v262_v41  ;;  %v1139_v38 = vadd.f32 %v2732_v27, %v2723_v29  ;;  %v1340_v44 = vmul.f32 %v2732_v27, %v2732_v27  ;;  %v674_v49 = vand.u32 2147483647, %v2748_v46 }
  0xb8   :  { %v1309_v4 = vmul.f32 %v2740_v40, %v2740_v40  ;;  %v648_v55 = vsel %vm2818_vm6, %v647_v21, %v643_v53  ;;  %vm685_vm12 = vweird.f32 %v2756_v50  ;;  %v691_v12 = vand.u32 2147483648, %v2756_v50 }
  0xb9   :  { %1140 = vadd.xlane.f32.xlu1 %v1139_v38  ;;  %v1094_v51 = vadd.f32 %v2742_v43, %v2740_v40  ;;  %v1310_v9 = vmul.f32 %v2742_v43, %v2742_v43  ;;  %v1419_v0 = vadd.f32 %v1340_v44, %v1339_v63  ;;  %v676_v38 = vand.u32 2147483648, %v2748_v46  ;;  %vm2906_vm14 = vmor %vm685_vm12, %vm686_vm13 }
  0xba   :  { %v663_v44 = vsel %vm2829_vm7, %v662_v37, %v658_v31  ;;  %vm2879_vm11 = vcmp.eq.f32.partialorder %v674_v49, 8.507059e+37  ;;  %v689_v46 = vand.u32 2147483647, %v2756_v50  ;;  %v2912_v30 = vmul.f32 2.0, %v648_v55 }
  0xbb   :  { %1095 = vadd.xlane.f32.xlu0 %v1094_v51  ;;  %v197_v56 = vpop.f32.mrf.mxu2  ;;  %v1374_v23 = vadd.f32 %v1310_v9, %v1309_v4  ;;  %v682_v51 = vsub.f32 1.0, %v681_v39  ;;  %v677_v4 = vor.u32 1.1754944e-38, %v676_v38  ;;  %v2118_v31 = vmul.f32 -1.442695, %v370_v47  ;;  %v374_v47 = vld [vmem:[#allocation7 + $0x98] sm:$0xff] }
  0xbc   :  { %v2770_v61 = vmul.f32 %v997_v10, %v197_v56  ;;  %v310_v62 = vpop.f32.mrf.mxu3  ;;  %v2860_v56 = vadd.f32 1.0, %v2236_v33  ;;  %vm690_vm15 = vcmp.eq.f32.partialorder %v689_v46, 8.507059e+37  ;;  %v2119_v38 = vmul.f32 -1.442695, %v371_v32 }
  0xbd   :  { %v2777_v2 = vmul.f32 %v998_v13, %v310_v62  ;;  %v152_v24 = vpop.f32.mrf.mxu0  ;;  %v683_v59 = vmul.f32 %v2814_v60, %v682_v51  ;;  %v2238_v62 = vpop.eup %2237  ;;  %v678_v50 = vsel %vm2879_vm11, %v677_v4, %v673_v16 }
  0xbe   :  { %v2783_v6 = vmul.f32 %v2746_v45, %v152_v24  ;;  %v265_v7 = vpop.f32.mrf.mxu1  ;;  %v1341_v34 = vmul.f32 %v2770_v61, %v2770_v61  ;;  %2239 = vrcp.f32 %v2860_v56  ;;  %v2896_v21 = vadd.f32 1.0, %v2238_v62 }
  0xbf   :  { %v2799_v10 = vmul.f32 %v2750_v17, %v265_v7  ;;  %v1142_v13 = vadd.f32 %v2777_v2, %v2770_v61  ;;  %v1342_v8 = vmul.f32 %v2777_v2, %v2777_v2  ;;  %v684_v20 = vadd.f32 %v2814_v60, %v683_v59 }
  0xc0   :  { %v1311_v26 = vmul.f32 %v2783_v6, %v2783_v6  ;;  %2241 = vpow2.f32 %v2117_v5  ;;  %v2932_v49 = vmul.f32 2.0, %v678_v50  ;;  %v704_v51 = vand.u32 2147483647, %v2860_v56 }
  0xc1   :  { %1143 = vadd.xlane.f32.xlu2 %v1142_v13  ;;  %v1097_v28 = vadd.f32 %v2799_v10, %v2783_v6  ;;  %v1422_v63 = vadd.f32 %v1342_v8, %v1341_v34  ;;  %2243 = vrcp.f32 %v2896_v21  ;;  %v688_v39 = vsel %vm2906_vm14, %v2814_v60, %v684_v20 }
  0xc2   :  { %2245 = vpow2.f32 %v2118_v31  ;;  %vm700_vm0 = vweird.f32 %v2860_v56  ;;  %v706_v24 = vand.u32 2147483648, %v2860_v56  ;;  %v721_v9 = vand.u32 2147483648, %v2896_v21  ;;  %v373_v31 = vld [vmem:[#allocation7 + $0x90] sm:$0xff] }
  0xc3   :  { %1420 = vadd.xlane.f32.xlu0 %v1419_v0  ;;  %1098 = vadd.xlane.f32.xlu1 %v1097_v28  ;;  %v200_v35 = vpop.f32.mrf.mxu2  ;;  %v1312_v0 = vmul.f32 %v2799_v10, %v2799_v10  ;;  %2247 = vpow2.f32 %v2119_v38  ;;  %vm2961_vm2 = vcmp.eq.f32.partialorder %v704_v51, 8.507059e+37  ;;  %vm715_vm4 = vweird.f32 %v2896_v21 }
  0xc4   :  { %v2843_v41 = vmul.f32 %v2746_v45, %v200_v35  ;;  %v313_v18 = vpop.f32.mrf.mxu3  ;;  %v692_v35 = vor.u32 1.1754944e-38, %v691_v12 }
  0xc5   :  { %v2849_v48 = vmul.f32 %v2750_v17, %v313_v18  ;;  %v155_v25 = vpop.f32.mrf.mxu0  ;;  %v2928_v18 = vpop.eup %2239 }
  0xc6   :  { %v1343_v45 = vmul.f32 %v2843_v41, %v2843_v41  ;;  %v2856_v22 = vmul.f32 %v2803_v15, %v155_v25  ;;  %v268_v54 = vpop.f32.mrf.mxu1  ;;  %v2242_v52 = vpop.eup %2241  ;;  %vm701_vm1 = vweird.f32 %v2928_v18 }
  0xc7   :  { %v1344_v17 = vmul.f32 %v2849_v48, %v2849_v48  ;;  %v2865_v57 = vmul.f32 %v2816_v19, %v268_v54  ;;  %v1145_v14 = vadd.f32 %v2849_v48, %v2843_v41  ;;  %v693_v54 = vsel %vm690_vm15, %v692_v35, %v688_v39  ;;  %vm2975_vm3 = vmor %vm700_vm0, %vm701_vm1 }
  0xc8   :  { %v1313_v11 = vmul.f32 %v2856_v22, %v2856_v22  ;;  %v2947_v62 = vadd.f32 1.0, %v2242_v52  ;;  %v1006_v12 = vmul.f32 2.0, %v693_v54  ;;  %v707_v35 = vor.u32 1.1754944e-38, %v706_v24 }
  0xc9   :  { %v1425_v7 = vadd.f32 %v1344_v17, %v1343_v45  ;;  %v1314_v13 = vmul.f32 %v2865_v57, %v2865_v57  ;;  %v1100_v25 = vadd.f32 %v2865_v57, %v2856_v22  ;;  %v3010_v52 = vmul.f32 -1.442695, %v373_v31 }
  0xca   :  { %2249 = vrcp.f32 %v2947_v62  ;;  %vm730_vm8 = vweird.f32 %v2947_v62  ;;  %v2122_v31 = vmul.f32 -1.442695, %v374_v47 }
  0xcb   :  { %1426 = vadd.xlane.f32.xlu2 %v1425_v7  ;;  %1375 = vadd.xlane.f32.xlu0 %v1374_v23  ;;  %v203_v36 = vpop.f32.mrf.mxu2  ;;  %v2914_v23 = vmul.f32 2.0, %v663_v44  ;;  %v1380_v34 = vadd.f32 %v1314_v13, %v1313_v11  ;;  %v719_v7 = vand.u32 2147483647, %v2896_v21  ;;  %v372_v11 = vld [vmem:[#allocation7 + $0x88] sm:$0xff] }
  0xcc   :  { %1423 = vadd.xlane.f32.xlu1 %v1422_v63  ;;  %v316_v28 = vpop.f32.mrf.mxu3  ;;  %v2917_v33 = vmul.f32 %v2803_v15, %v203_v36  ;;  %v1377_v15 = vadd.f32 %v1312_v0, %v1311_v26  ;;  %v2949_v63 = vpop.eup %2243 }
  0xcd   :  { %v2923_v8 = vmul.f32 %v2816_v19, %v316_v28  ;;  %v158_v37 = vpop.f32.mrf.mxu0  ;;  %v696_v19 = vmul.f32 %v2928_v18, %v2860_v56  ;;  %v711_v5 = vmul.f32 %v2949_v63, %v2896_v21  ;;  %v2246_v0 = vpop.eup %2245  ;;  %vm716_vm5 = vweird.f32 %v2949_v63 }
  0xce   :  { %v271_v42 = vpop.f32.mrf.mxu1  ;;  %v2938_v45 = vmul.f32 %v2912_v30, %v158_v37  ;;  %v1345_v60 = vmul.f32 %v2917_v33, %v2917_v33  ;;  %vm2983_vm6 = vcmp.eq.f32.partialorder %v719_v7, 8.507059e+37  ;;  %v2248_v37 = vpop.eup %2247  ;;  %vm3004_vm7 = vmor %vm715_vm4, %vm716_vm5  ;;  %v734_v7 = vand.u32 2147483647, %v2947_v62 }
  0xcf   :  { %v2943_v55 = vmul.f32 %v2914_v23, %v271_v42  ;;  %v1346_v17 = vmul.f32 %v2923_v8, %v2923_v8  ;;  %v697_v59 = vsub.f32 1.0, %v696_v19  ;;  %v712_v53 = vsub.f32 1.0, %v711_v5 }
  0xd0   :  { %4137 = vst [vmem:[#allocation12_spill] sm:$0xff] %v2938_v45  ;;  %v1315_v46 = vmul.f32 %v2938_v45, %v2938_v45  ;;  %v1148_v32 = vadd.f32 %v2923_v8, %v2917_v33  ;;  %vm3052_vm10 = vcmp.eq.f32.partialorder %v734_v7, 8.507059e+37 }
  0xd1   :  { %4138 = vst [vmem:[#allocation13_spill] sm:$0xff] %v2943_v55  ;;  %v698_v4 = vmul.f32 %v2928_v18, %v697_v59  ;;  %v1428_v13 = vadd.f32 %v1346_v17, %v1345_v60  ;;  %v1103_v36 = vadd.f32 %v2943_v55, %v2938_v45  ;;  %v1316_v16 = vmul.f32 %v2943_v55, %v2943_v55 }
  0xd2   :  { %v713_v38 = vmul.f32 %v2949_v63, %v712_v53 }
  0xd3   :  { %1146 = vadd.xlane.f32.xlu0 %v1145_v14  ;;  %1381 = vadd.xlane.f32.xlu2 %v1380_v34  ;;  %v206_v58 = vpop.f32.mrf.mxu2  ;;  %v699_v20 = vadd.f32 %v2928_v18, %v698_v4  ;;  %v2120_v14 = vmul.f32 -1.442695, %v372_v11  ;;  %v722_v34 = vor.u32 1.1754944e-38, %v721_v9  ;;  %v1383_v19 = vadd.f32 %v1316_v16, %v1315_v46 }
  0xd4   :  { %1378 = vadd.xlane.f32.xlu1 %v1377_v15  ;;  %v319_v44 = vpop.f32.mrf.mxu3  ;;  %v2988_v39 = vmul.f32 %v2912_v30, %v206_v58  ;;  %v714_v17 = vadd.f32 %v2949_v63, %v713_v38 }
  0xd5   :  { %v161_v28 = vpop.f32.mrf.mxu0  ;;  %v2991_v15 = vmul.f32 %v2914_v23, %v319_v44  ;;  %v703_v42 = vsel %vm2975_vm3, %v2928_v18, %v699_v20  ;;  %v3008_v23 = vadd.f32 1.0, %v2246_v0  ;;  %v3012_v18 = vpop.eup %2249  ;;  %2251 = vpow2.f32 %v2120_v14 }
  0xd6   :  { %v274_v50 = vpop.f32.mrf.mxu1  ;;  %4145 = vst [vmem:[#allocation14_spill] sm:$0xff] %v2988_v39  ;;  %v2998_v51 = vmul.f32 %v2932_v49, %v161_v28  ;;  %v1347_v54 = vmul.f32 %v2988_v39, %v2988_v39  ;;  %v708_v58 = vsel %vm2961_vm2, %v707_v35, %v703_v42  ;;  %v726_v59 = vmul.f32 %v3012_v18, %v2947_v62 }
  0xd7   :  { %4146 = vst [vmem:[#allocation15_spill] sm:$0xff] %v2991_v15  ;;  %v3014_v60 = vmul.f32 %v1006_v12, %v274_v50  ;;  %2253 = vrcp.f32 %v3008_v23  ;;  %v3024_v44 = vadd.f32 1.0, %v2248_v37  ;;  %v1348_v4 = vmul.f32 %v2991_v15, %v2991_v15 }
  0xd8   :  { %4147 = vst [vmem:[#allocation16_spill] sm:$0xff] %v2998_v51  ;;  %v718_v5 = vsel %vm3004_vm7, %v2949_v63, %v714_v17  ;;  %v1317_v9 = vmul.f32 %v2998_v51, %v2998_v51  ;;  %v727_v46 = vsub.f32 1.0, %v726_v59  ;;  %vm731_vm9 = vweird.f32 %v3012_v18 }
  0xd9   :  { %4150 = vst [vmem:[#allocation17_spill] sm:$0xff] %v3014_v60  ;;  %v1318_v11 = vmul.f32 %v3014_v60, %v3014_v60  ;;  %v736_v63 = vand.u32 2147483648, %v2947_v62  ;;  %v723_v20 = vsel %vm2983_vm6, %v722_v34, %v718_v5  ;;  %2255 = vrcp.f32 %v3024_v44  ;;  %vm3065_vm11 = vmor %vm730_vm8, %vm731_vm9 }
  0xda   :  { %v728_v26 = vmul.f32 %v3012_v18, %v727_v46  ;;  %v1431_v28 = vadd.f32 %v1348_v4, %v1347_v54  ;;  %v1008_v42 = vmul.f32 2.0, %v723_v20  ;;  %v749_v30 = vand.u32 2147483647, %v3008_v23 }
  0xdb   :  { %1429 = vadd.xlane.f32.xlu0 %v1428_v13  ;;  %1104 = vadd.xlane.f32.xlu2 %v1103_v36  ;;  %v209_v21 = vpop.f32.mrf.mxu2  ;;  %v1007_v36 = vmul.f32 2.0, %v708_v58  ;;  %v2252_v0 = vpop.eup %2251  ;;  %v3071_v38 = vadd.f32 %v1318_v11, %v1317_v9  ;;  %v737_v58 = vor.u32 1.1754944e-38, %v736_v63  ;;  %vm745_vm12 = vweird.f32 %v3008_v23  ;;  %v375_v9 = vld [vmem:[#allocation7 + $0xa0] sm:$0xff] }
  0xdc   :  { %1101 = vadd.xlane.f32.xlu1 %v1100_v25  ;;  %v1151_v25 = vadd.f32 %v2991_v15, %v2988_v39  ;;  %v322_v24 = vpop.f32.mrf.mxu3  ;;  %v3040_v13 = vmul.f32 %v2932_v49, %v209_v21  ;;  %v1106_v49 = vadd.f32 %v3014_v60, %v2998_v51  ;;  %v729_v56 = vadd.f32 %v3012_v18, %v728_v26 }
  0xdd   :  { %v3044_v16 = vmul.f32 %v1006_v12, %v322_v24  ;;  %v164_v53 = vpop.f32.mrf.mxu0  ;;  %v2254_v12 = vpop.eup %2253  ;;  %v3069_v37 = vadd.f32 1.0, %v2252_v0  ;;  %v751_v62 = vand.u32 2147483648, %v3008_v23  ;;  %v766_v7 = vand.u32 2147483648, %v3024_v44 }
  0xde   :  { %4151 = vst [vmem:[#allocation18_spill] sm:$0xff] %v3040_v13  ;;  %v1349_v50 = vmul.f32 %v3040_v13, %v3040_v13  ;;  %v3075_v54 = vmul.f32 %v1007_v36, %v164_v53  ;;  %v277_v17 = vpop.f32.mrf.mxu1  ;;  %vm746_vm13 = vweird.f32 %v2254_v12  ;;  %vm3096_vm14 = vcmp.eq.f32.partialorder %v749_v30, 8.507059e+37 }
  0xdf   :  { %4152 = vst [vmem:[#allocation19_spill] sm:$0xff] %v3044_v16  ;;  %v1350_v35 = vmul.f32 %v3044_v16, %v3044_v16  ;;  %v1154_v59 = vadd.f32 %v3044_v16, %v3040_v13  ;;  %v3084_v24 = vpop.eup %2255  ;;  %2257 = vrcp.f32 %v3069_v37  ;;  %v3094_v11 = vmul.f32 %v1008_v42, %v277_v17  ;;  %vm3106_vm15 = vmor %vm745_vm12, %vm746_vm13 }
  0xe0   :  { %v3090_v5 = vmul.f32 %v3075_v54, %v3075_v54  ;;  %v756_v63 = vmul.f32 %v3084_v24, %v3024_v44  ;;  %v752_v0 = vor.u32 1.1754944e-38, %v751_v62  ;;  %vm760_vm0 = vweird.f32 %v3024_v44 }
  0xe1   :  { %v3086_v4 = vadd.f32 %v1350_v35, %v1349_v50  ;;  %vm761_vm1 = vweird.f32 %v3084_v24  ;;  %2259 = vpow2.f32 %v3010_v52  ;;  %v2123_v35 = vmul.f32 -1.442695, %v375_v9 }
  0xe2   :  { %v757_v50 = vsub.f32 1.0, %v756_v63  ;;  %v767_v34 = vor.u32 1.1754944e-38, %v766_v7  ;;  %v1109_v30 = vadd.f32 %v3094_v11, %v3075_v54  ;;  %2261 = vpow2.f32 %v2122_v31  ;;  %vm3133_vm2 = vmor %vm760_vm0, %vm761_vm1  ;;  %v377_v31 = vld [vmem:[#allocation7 + $0xb0] sm:$0xff] }
  0xe3   :  { %1384 = vadd.xlane.f32.xlu0 %v1383_v19  ;;  %1152 = vadd.xlane.f32.xlu2 %v1151_v25  ;;  %v741_v19 = vmul.f32 %v2254_v12, %v3008_v23  ;;  %v212_v21 = vpop.f32.mrf.mxu2  ;;  %v764_v23 = vand.u32 2147483647, %v3024_v44  ;;  %2263 = vpow2.f32 %v2123_v35  ;;  %v2125_v26 = vmul.f32 -1.442695, %v377_v31 }
  0xe4   :  { %1149 = vadd.xlane.f32.xlu1 %v1148_v32  ;;  %v733_v32 = vsel %vm3065_vm11, %v3012_v18, %v729_v56  ;;  %v325_v46 = vpop.f32.mrf.mxu3  ;;  %v3113_v14 = vmul.f32 %v1007_v36, %v212_v21  ;;  %v758_v52 = vmul.f32 %v3084_v24, %v757_v50  ;;  %v1320_v36 = vmul.f32 %v3094_v11, %v3094_v11 }
  0xe5   :  { %v742_v25 = vsub.f32 1.0, %v741_v19  ;;  %v738_v20 = vsel %vm3052_vm10, %v737_v58, %v733_v32  ;;  %v3115_v56 = vmul.f32 %v1008_v42, %v325_v46  ;;  %v376_v19 = vld [vmem:[#allocation7 + $0xa8] sm:$0xff]  ;;  %v3123_v58 = vpop.eup %2257  ;;  %vm765_vm3 = vcmp.eq.f32.partialorder %v764_v23, 8.507059e+37 }
  0xe6   :  { %v771_v32 = vmul.f32 %v3123_v58, %v3069_v37  ;;  %v1351_v7 = vmul.f32 %v3113_v14, %v3113_v14  ;;  %v280_v9 = vpop.f32.mrf.mxu1  ;;  %v779_v46 = vand.u32 2147483647, %v3069_v37  ;;  %vm775_vm4 = vweird.f32 %v3069_v37 }
  0xe7   :  { %v743_v47 = vmul.f32 %v2254_v12, %v742_v25  ;;  %v2124_v25 = vmul.f32 -1.442695, %v376_v19  ;;  %v1352_v44 = vmul.f32 %v3115_v56, %v3115_v56  ;;  %vm776_vm5 = vweird.f32 %v3123_v58 }
  0xe8   :  { %v772_v63 = vsub.f32 1.0, %v771_v32  ;;  %vm3168_vm6 = vmor %vm775_vm4, %vm776_vm5  ;;  %vm3172_vm7 = vcmp.eq.f32.partialorder %v779_v46, 8.507059e+37  ;;  %v1157_v46 = vadd.f32 %v3115_v56, %v3113_v14 }
  0xe9   :  { %v744_v53 = vadd.f32 %v2254_v12, %v743_v47  ;;  %v2260_v47 = vpop.eup %2259  ;;  %2265 = vpow2.f32 %v2124_v25 }
  0xeb   :  { %1155 = vadd.xlane.f32.xlu0 %v1154_v59  ;;  %1107 = vadd.xlane.f32.xlu2 %v1106_v49  ;;  %v748_v17 = vsel %vm3106_vm15, %v2254_v12, %v744_v53  ;;  %v1009_v49 = vmul.f32 2.0, %v738_v20  ;;  %v215_v21 = vpop.f32.mrf.mxu2  ;;  %v167_v12 = vpop.f32.mrf.mxu0  ;;  %v759_v59 = vadd.f32 %v3084_v24, %v758_v52  ;;  %v781_v20 = vand.u32 2147483648, %v3069_v37 }
  0xec   :  { %1432 = vadd.xlane.f32.xlu1 %v1431_v28  ;;  %v753_v42 = vsel %vm3096_vm14, %v752_v0, %v748_v17  ;;  %v3151_v0 = vadd.f32 1.0, %v2260_v47  ;;  %v2262_v53 = vpop.eup %2261  ;;  %v328_v23 = vpop.f32.mrf.mxu3  ;;  %v1437_v52 = vadd.f32 %v1352_v44, %v1351_v7 }
  0xed   :  { %v1010_v62 = vmul.f32 2.0, %v753_v42  ;;  %v763_v18 = vsel %vm3133_vm2, %v3084_v24, %v759_v59  ;;  %v3153_v50 = vmul.f32 %v1009_v49, %v167_v12  ;;  %v2264_v17 = vpop.eup %2263  ;;  %v1389_v24 = vadd.f32 %v1320_v36, %v3090_v5 }
  0xee   :  { %v768_v19 = vsel %vm765_vm3, %v767_v34, %v763_v18  ;;  %v773_v42 = vmul.f32 %v3123_v58, %v772_v63  ;;  %2267 = vrcp.f32 %v3151_v0  ;;  %v3162_v28 = vmul.f32 %v1009_v49, %v215_v21  ;;  %v378_v21 = vld [vmem:[#allocation7 + $0xb8] sm:$0xff] }
  0xef   :  { %v3155_v35 = vmul.f32 %v1010_v62, %v280_v9  ;;  %v782_v5 = vor.u32 1.1754944e-38, %v781_v20  ;;  %2269 = vpow2.f32 %v2125_v26  ;;  %v1011_v36 = vmul.f32 2.0, %v768_v19  ;;  %v2266_v9 = vpop.eup %2265 }
  0xf0   :  { %v3179_v49 = vadd.f32 1.0, %v2262_v53  ;;  %v1321_v37 = vmul.f32 %v3153_v50, %v3153_v50  ;;  %v1353_v59 = vmul.f32 %v3162_v28, %v3162_v28  ;;  %v3187_v32 = vadd.f32 1.0, %v2264_v17 }
  0xf1   :  { %v1322_v31 = vmul.f32 %v3155_v35, %v3155_v35  ;;  %v794_v44 = vand.u32 2147483647, %v3151_v0  ;;  %v2126_v18 = vmul.f32 -1.442695, %v378_v21  ;;  %v1112_v20 = vadd.f32 %v3155_v35, %v3153_v50 }
  0xf2   :  { %2271 = vrcp.f32 %v3179_v49  ;;  %v796_v53 = vand.u32 2147483648, %v3151_v0  ;;  %vm790_vm8 = vweird.f32 %v3151_v0  ;;  %vm805_vm12 = vweird.f32 %v3179_v49 }
  0xf3   :  { %1435 = vadd.xlane.f32.xlu2 %v3086_v4  ;;  %1110 = vadd.xlane.f32.xlu0 %v1109_v30  ;;  %v3176_v30 = vmul.f32 %v1010_v62, %v328_v23  ;;  %v170_v12 = vpop.f32.mrf.mxu0  ;;  %v218_v62 = vpop.f32.mrf.mxu2  ;;  %2273 = vrcp.f32 %v3187_v32  ;;  %v1392_v19 = vadd.f32 %v1322_v31, %v1321_v37  ;;  %vm3214_vm9 = vcmp.eq.f32.partialorder %v794_v44, 8.507059e+37 }
  0xf4   :  { %1387 = vadd.xlane.f32.xlu1 %v3071_v38  ;;  %v774_v38 = vadd.f32 %v3123_v58, %v773_v42  ;;  %v2268_v63 = vpop.eup %2267  ;;  %v3205_v26 = vmul.f32 %v1011_v36, %v170_v12  ;;  %v3208_v17 = vmul.f32 %v1011_v36, %v218_v62  ;;  %v331_v36 = vpop.f32.mrf.mxu3  ;;  %v3222_v37 = vadd.f32 1.0, %v2266_v9 }
  0xf5   :  { %v1354_v7 = vmul.f32 %v3176_v30, %v3176_v30  ;;  %v2270_v23 = vpop.eup %2269  ;;  %v786_v42 = vmul.f32 %v2268_v63, %v3151_v0  ;;  %vm791_vm10 = vweird.f32 %v2268_v63  ;;  %2275 = vpow2.f32 %v2126_v18 }
  0xf6   :  { %v778_v25 = vsel %vm3168_vm6, %v3123_v58, %v774_v38  ;;  %v1160_v58 = vadd.f32 %v3176_v30, %v3162_v28  ;;  %4167 = vst [vmem:[#allocation20_spill] sm:$0xff] %v3205_v26  ;;  %v3220_v38 = vmul.f32 %v3205_v26, %v3205_v26  ;;  %v797_v31 = vor.u32 1.1754944e-38, %v796_v53  ;;  %vm3241_vm11 = vmor %vm790_vm8, %vm791_vm10 }
  0xf7   :  { %v783_v47 = vsel %vm3172_vm7, %v782_v5, %v778_v25  ;;  %4168 = vst [vmem:[#allocation21_spill] sm:$0xff] %v3208_v17  ;;  %v3212_v4 = vadd.f32 %v1354_v7, %v1353_v59  ;;  %v787_v21 = vsub.f32 1.0, %v786_v42  ;;  %v809_v12 = vand.u32 2147483647, %v3179_v49 }
  0xf8   :  { %v1012_v34 = vmul.f32 2.0, %v783_v47  ;;  %v3227_v59 = vmul.f32 %v3208_v17, %v3208_v17  ;;  %v3229_v62 = vadd.f32 1.0, %v2270_v23  ;;  %v811_v9 = vand.u32 2147483648, %v3179_v49 }
  0xf9   :  { %v788_v7 = vmul.f32 %v2268_v63, %v787_v21  ;;  %2277 = vrcp.f32 %v3222_v37  ;;  %v824_v53 = vand.u32 2147483647, %v3187_v32  ;;  %vm820_vm14 = vweird.f32 %v3187_v32 }
  0xfa   :  { %v826_v0 = vand.u32 2147483648, %v3187_v32  ;;  %2279 = vrcp.f32 %v3229_v62  ;;  %vm3256_vm15 = vcmp.eq.f32.partialorder %v809_v12, 8.507059e+37  ;;  %vm835_vm3 = vweird.f32 %v3222_v37 }
  0xfb   :  { %1390 = vadd.xlane.f32.xlu2 %v1389_v24  ;;  %1438 = vadd.xlane.f32.xlu0 %v1437_v52  ;;  %v2272_v24 = vpop.eup %2271  ;;  %v283_v52 = vpop.f32.mrf.mxu1  ;;  %v789_v42 = vadd.f32 %v2268_v63, %v788_v7  ;;  %vm3271_vm1 = vcmp.eq.f32.partialorder %v824_v53, 8.507059e+37  ;;  %v854_v39 = vand.u32 2147483647, %v3229_v62  ;;  %vm850_vm8 = vweird.f32 %v3229_v62 }
  0xfc   :  { %1158 = vadd.xlane.f32.xlu1 %v1157_v46  ;;  %v3231_v25 = vpop.eup %2273  ;;  %v801_v44 = vmul.f32 %v2272_v24, %v3179_v49  ;;  %v3236_v46 = vmul.f32 %v1012_v34, %v331_v36  ;;  %v3249_v23 = vmul.f32 %v1012_v34, %v283_v52  ;;  %vm806_vm13 = vweird.f32 %v2272_v24 }
  0xfd   :  { %v816_v18 = vmul.f32 %v3231_v25, %v3187_v32  ;;  %v2276_v16 = vpop.eup %2275  ;;  %v793_v13 = vsel %vm3241_vm11, %v2268_v63, %v789_v42  ;;  %v812_v34 = vor.u32 1.1754944e-38, %v811_v9  ;;  %vm3266_vm0 = vmor %vm805_vm12, %vm806_vm13  ;;  %vm821_vm2 = vweird.f32 %v3231_v25 }
  0xfe   :  { %4171 = vst [vmem:[#allocation22_spill] sm:$0xff] %v3236_v46  ;;  %v802_v21 = vsub.f32 1.0, %v801_v44  ;;  %v1163_v52 = vadd.f32 %v3236_v46, %v3208_v17  ;;  %v798_v7 = vsel %vm3214_vm9, %v797_v31, %v793_v13  ;;  %v1324_v13 = vmul.f32 %v3249_v23, %v3249_v23  ;;  %v334_v44 = vpop.f32.mrf.mxu3  ;;  %vm3303_vm5 = vmor %vm820_vm14, %vm821_vm2 }
  0xff   :  { %4174 = vst [vmem:[#allocation23_spill] sm:$0xff] %v3249_v23  ;;  %v817_v36 = vsub.f32 1.0, %v816_v18  ;;  %v3281_v49 = vadd.f32 1.0, %v2276_v16  ;;  %v1356_v31 = vmul.f32 %v3236_v46, %v3236_v46  ;;  %v173_v18 = vpop.f32.mrf.mxu0  ;;  %v221_v46 = vpop.f32.mrf.mxu2  ;;  %vm3339_vm9 = vcmp.eq.f32.partialorder %v854_v39, 8.507059e+37  ;;  %v381_v39 = vld [vmem:[#allocation7 + $0xd0] sm:$0xff] }
 0x100   :  { %v803_v15 = vmul.f32 %v2272_v24, %v802_v21 }
 0x101   :  { %v818_v63 = vmul.f32 %v3231_v25, %v817_v36  ;;  %2281 = vrcp.f32 %v3281_v49  ;;  %v1443_v32 = vadd.f32 %v1356_v31, %v3227_v59  ;;  %vm865_vm11 = vweird.f32 %v3281_v49 }
 0x102   :  { %v804_v5 = vadd.f32 %v2272_v24, %v803_v15  ;;  %v839_v15 = vand.u32 2147483647, %v3222_v37 }
 0x103   :  { %1161 = vadd.xlane.f32.xlu2 %v1160_v58  ;;  %1393 = vadd.xlane.f32.xlu0 %v1392_v19  ;;  %v3275_v58 = vpop.eup %2277  ;;  %v1115_v19 = vadd.f32 %v3249_v23, %v3205_v26  ;;  %v286_v53 = vpop.f32.mrf.mxu1  ;;  %v819_v21 = vadd.f32 %v3231_v25, %v818_v63  ;;  %v1395_v63 = vadd.f32 %v1324_v13, %v3220_v38 }
 0x104   :  { %1113 = vadd.xlane.f32.xlu1 %v1112_v20  ;;  %v831_v9 = vmul.f32 %v3275_v58, %v3222_v37  ;;  %v1013_v20 = vmul.f32 2.0, %v798_v7  ;;  %v808_v47 = vsel %vm3266_vm0, %v2272_v24, %v804_v5  ;;  %v3293_v16 = vpop.eup %2279  ;;  %vm836_vm4 = vweird.f32 %v3275_v58 }
 0x105   :  { %v813_v42 = vsel %vm3256_vm15, %v812_v34, %v808_v47  ;;  %v841_v5 = vand.u32 2147483648, %v3222_v37  ;;  %v856_v34 = vand.u32 2147483648, %v3229_v62  ;;  %vm3319_vm6 = vmor %vm835_vm3, %vm836_vm4  ;;  %vm3323_vm7 = vcmp.eq.f32.partialorder %v839_v15, 8.507059e+37 }
 0x106   :  { %v832_v36 = vsub.f32 1.0, %v831_v9  ;;  %v1014_v7 = vmul.f32 2.0, %v813_v42  ;;  %v827_v9 = vor.u32 1.1754944e-38, %v826_v0  ;;  %v846_v42 = vmul.f32 %v3293_v16, %v3229_v62 }
 0x107   :  { %v3314_v17 = vmul.f32 %v1013_v20, %v173_v18  ;;  %v823_v59 = vsel %vm3303_vm5, %v3231_v25, %v819_v21  ;;  %v3334_v13 = vpop.eup %2281  ;;  %v3337_v31 = vmul.f32 %v1013_v20, %v221_v46  ;;  %v842_v15 = vor.u32 1.1754944e-38, %v841_v5  ;;  %v379_v46 = vld [vmem:[#allocation7 + $0xc0] sm:$0xff] }
 0x108   :  { %v833_v47 = vmul.f32 %v3275_v58, %v832_v36  ;;  %v3328_v38 = vmul.f32 %v1014_v7, %v286_v53  ;;  %v847_v0 = vsub.f32 1.0, %v846_v42  ;;  %vm851_vm10 = vweird.f32 %v3293_v16  ;;  %v382_v42 = vld [vmem:[#allocation7 + $0xd8] sm:$0xff] }
 0x109   :  { %4183 = vst [vmem:[#allocation24_spill] sm:$0xff] %v3314_v17  ;;  %v861_v53 = vmul.f32 %v3334_v13, %v3281_v49  ;;  %v3350_v20 = vmul.f32 %v1014_v7, %v334_v44  ;;  %v828_v21 = vsel %vm3271_vm1, %v827_v9, %v823_v59  ;;  %v869_v36 = vand.u32 2147483647, %v3281_v49  ;;  %v224_v44 = vpop.f32.mrf.mxu2  ;;  %vm3366_vm12 = vmor %vm850_vm8, %vm851_vm10 }
 0x10a   :  { %4188 = vst [vmem:[#allocation25_spill] sm:$0xff] %v3328_v38  ;;  %v834_v37 = vadd.f32 %v3275_v58, %v833_v47  ;;  %v848_v25 = vmul.f32 %v3293_v16, %v847_v0  ;;  %v1118_v23 = vadd.f32 %v3328_v38, %v3314_v17  ;;  %v871_v5 = vand.u32 2147483648, %v3281_v49 }
 0x10b   :  { %1164 = vadd.xlane.f32.xlu0 %v1163_v52  ;;  %1116 = vadd.xlane.f32.xlu2 %v1115_v19  ;;  %4189 = vst [vmem:[#allocation26_spill] sm:$0xff] %v3337_v31  ;;  %v857_v52 = vor.u32 1.1754944e-38, %v856_v34  ;;  %v862_v24 = vsub.f32 1.0, %v861_v53  ;;  %v337_v34 = vpop.f32.mrf.mxu3  ;;  %vm866_vm13 = vweird.f32 %v3334_v13  ;;  %v2127_v47 = vmul.f32 -1.442695, %v379_v46 }
 0x10c   :  { %1441 = vadd.xlane.f32.xlu1 %v3212_v4  ;;  %v838_v19 = vsel %vm3319_vm6, %v3275_v58, %v834_v37  ;;  %v380_v4 = vld [vmem:[#allocation7 + $0xc8] sm:$0xff]  ;;  %4192 = vst [vmem:[#allocation27_spill] sm:$0xff] %v3350_v20  ;;  %v849_v58 = vadd.f32 %v3293_v16, %v848_v25  ;;  %v1325_v59 = vmul.f32 %v3314_v17, %v3314_v17  ;;  %v1015_v37 = vmul.f32 2.0, %v828_v21  ;;  %v176_v25 = vpop.f32.mrf.mxu0  ;;  %vm3387_vm14 = vmor %vm865_vm11, %vm866_vm13 }
 0x10d   :  { %v843_v7 = vsel %vm3323_vm7, %v842_v15, %v838_v19  ;;  %v2128_v9 = vmul.f32 -1.442695, %v380_v4  ;;  %v1357_v26 = vmul.f32 %v3337_v31, %v3337_v31  ;;  %v863_v0 = vmul.f32 %v3334_v13, %v862_v24  ;;  %v383_v15 = vld [vmem:[#allocation7 + $0xe0] sm:$0xff]  ;;  %v289_v4 = vpop.f32.mrf.mxu1 }
 0x10e   :  { %v1326_v62 = vmul.f32 %v3328_v38, %v3328_v38  ;;  %v1358_v19 = vmul.f32 %v3350_v20, %v3350_v20  ;;  %v2129_v53 = vmul.f32 -1.442695, %v381_v39  ;;  %v1016_v46 = vmul.f32 2.0, %v843_v7 }
 0x10f   :  { %2283 = vpow2.f32 %v2128_v9  ;;  %v853_v21 = vsel %vm3366_vm12, %v3293_v16, %v849_v58  ;;  %v872_v38 = vor.u32 1.1754944e-38, %v871_v5  ;;  %v2130_v17 = vmul.f32 -1.442695, %v382_v42  ;;  %v384_v16 = vld [vmem:[#allocation7 + $0xe8] sm:$0xff] }
 0x110   :  { %vm870_vm15 = vcmp.eq.f32.partialorder %v869_v36, 8.507059e+37  ;;  %2285 = vpow2.f32 %v2127_v47  ;;  %v3392_v39 = vmul.f32 %v1015_v37, %v176_v25  ;;  %v1398_v58 = vadd.f32 %v1326_v62, %v1325_v59 }
 0x111   :  { %2287 = vpow2.f32 %v2129_v53  ;;  %v3394_v7 = vmul.f32 %v1015_v37, %v224_v44  ;;  %v858_v49 = vsel %vm3339_vm9, %v857_v52, %v853_v21  ;;  %v3401_v12 = vmul.f32 %v1016_v46, %v289_v4  ;;  %v385_v37 = vld [vmem:[#allocation7 + $0xf0] sm:$0xff] }
 0x112   :  { %4197 = vst [vmem:[#allocation28_spill] sm:$0xff] %v3392_v39  ;;  %2289 = vpow2.f32 %v2130_v17  ;;  %v1166_v47 = vadd.f32 %v3350_v20, %v3337_v31  ;;  %v3405_v42 = vmul.f32 %v1016_v46, %v337_v34  ;;  %v2132_v44 = vmul.f32 -1.442695, %v384_v16 }
 0x113   :  { %1444 = vadd.xlane.f32.xlu2 %v1443_v32  ;;  %1119 = vadd.xlane.f32.xlu0 %v1118_v23  ;;  %v864_v32 = vadd.f32 %v3334_v13, %v863_v0  ;;  %v2131_v23 = vmul.f32 -1.442695, %v383_v15  ;;  %4198 = vst [vmem:[#allocation29_spill] sm:$0xff] %v3394_v7  ;;  %v1017_v59 = vmul.f32 2.0, %v858_v49  ;;  %v1328_v34 = vmul.f32 %v3401_v12, %v3401_v12 }
 0x114   :  { %1396 = vadd.xlane.f32.xlu1 %v1395_v63  ;;  %v1446_v63 = vadd.f32 %v1358_v19, %v1357_v26  ;;  %4199 = vst [vmem:[#allocation30_spill] sm:$0xff] %v3401_v12  ;;  %v227_v26 = vpop.f32.mrf.mxu2  ;;  %v179_v62 = vpop.f32.mrf.mxu0  ;;  %v1359_v19 = vmul.f32 %v3394_v7, %v3394_v7  ;;  %v1360_v25 = vmul.f32 %v3405_v42, %v3405_v42  ;;  %v2133_v46 = vmul.f32 -1.442695, %v385_v37 }
 0x115   :  { %v868_v5 = vsel %vm3387_vm14, %v3334_v13, %v864_v32  ;;  %v2284_v9 = vpop.eup %2283  ;;  %4200 = vst [vmem:[#allocation31_spill] sm:$0xff] %v3405_v42  ;;  %2291 = vpow2.f32 %v2131_v23  ;;  %v1327_v13 = vmul.f32 %v3392_v39, %v3392_v39  ;;  %v292_v15 = vpop.f32.mrf.mxu1  ;;  %v1169_v53 = vadd.f32 %v3405_v42, %v3394_v7 }
 0x116   :  { %v873_v36 = vsel %vm870_vm15, %v872_v38, %v868_v5  ;;  %v3407_v52 = vadd.f32 1.0, %v2284_v9  ;;  %v2286_v0 = vpop.eup %2285  ;;  %v340_v38 = vpop.f32.mrf.mxu3  ;;  %v1121_v24 = vadd.f32 %v3401_v12, %v3392_v39  ;;  %v3424_v32 = vmul.f32 %v1017_v59, %v227_v26 }
 0x117   :  { %v1018_v18 = vmul.f32 2.0, %v873_v36  ;;  %v2288_v17 = vpop.eup %2287  ;;  %v3420_v4 = vadd.f32 1.0, %v2286_v0  ;;  %v3432_v5 = vmul.f32 %v1017_v59, %v179_v62  ;;  %v1401_v36 = vadd.f32 %v1328_v34, %v1327_v13 }
 0x118   :  { %2293 = vrcp.f32 %v3407_v52  ;;  %v2290_v21 = vpop.eup %2289  ;;  %4201 = vst [vmem:[#allocation32_spill] sm:$0xff] %v3424_v32  ;;  %v3428_v16 = vadd.f32 1.0, %v2288_v17  ;;  %v3436_v9 = vadd.f32 %v1360_v25, %v1359_v19  ;;  %vm895_vm0 = vweird.f32 %v3407_v52 }
 0x119   :  { %2295 = vpow2.f32 %v2132_v44  ;;  %v3426_v23 = vmul.f32 %v1018_v18, %v340_v38  ;;  %v3430_v49 = vmul.f32 %v1018_v18, %v292_v15  ;;  %4204 = vst [vmem:[#allocation35_spill] sm:$0xff] %v3432_v5  ;;  %v1329_v44 = vmul.f32 %v3432_v5, %v3432_v5 }
 0x11a   :  { %2297 = vrcp.f32 %v3420_v4  ;;  %v1361_v59 = vmul.f32 %v3424_v32, %v3424_v32  ;;  %v3449_v13 = vadd.f32 1.0, %v2290_v21  ;;  %vm880_vm2 = vweird.f32 %v3420_v4 }
 0x11b   :  { %1399 = vadd.xlane.f32.xlu2 %v1398_v58  ;;  %1447 = vadd.xlane.f32.xlu0 %v1446_v63  ;;  %4202 = vst [vmem:[#allocation33_spill] sm:$0xff] %v3426_v23  ;;  %v2292_v58 = vpop.eup %2291  ;;  %v899_v63 = vand.u32 2147483647, %v3407_v52  ;;  %2299 = vrcp.f32 %v3428_v16  ;;  %v1172_v37 = vadd.f32 %v3426_v23, %v3424_v32  ;;  %v1330_v0 = vmul.f32 %v3430_v49, %v3430_v49 }
 0x11c   :  { %1167 = vadd.xlane.f32.xlu1 %v1166_v47  ;;  %4203 = vst [vmem:[#allocation34_spill] sm:$0xff] %v3430_v49  ;;  %v901_v47 = vand.u32 2147483648, %v3407_v52  ;;  %2301 = vpow2.f32 %v2133_v46  ;;  %v3451_v26 = vadd.f32 1.0, %v2292_v58  ;;  %v1124_v17 = vadd.f32 %v3430_v49, %v3432_v5 }
 0x11d   :  { %vm3456_vm1 = vcmp.eq.f32.partialorder %v899_v63, 8.507059e+37  ;;  %v1362_v62 = vmul.f32 %v3426_v23, %v3426_v23  ;;  %v884_v25 = vand.u32 2147483647, %v3420_v4  ;;  %2303 = vrcp.f32 %v3449_v13 }
 0x11e   :  { %v2294_v18 = vpop.eup %2293  ;;  %v902_v19 = vor.u32 1.1754944e-38, %v901_v47  ;;  %v886_v58 = vand.u32 2147483648, %v3420_v4  ;;  %2305 = vrcp.f32 %v3451_v26  ;;  %v914_v47 = vand.u32 2147483647, %v3428_v16 }
 0x11f   :  { %v2296_v38 = vpop.eup %2295  ;;  %v891_v34 = vmul.f32 %v2294_v18, %v3407_v52  ;;  %vm896_vm3 = vweird.f32 %v2294_v18  ;;  %v916_v49 = vand.u32 2147483648, %v3428_v16  ;;  %vm3488_vm6 = vcmp.eq.f32.partialorder %v884_v25, 8.507059e+37 }
 0x120   :  { %v2298_v46 = vpop.eup %2297  ;;  %v3473_v23 = vadd.f32 1.0, %v2296_v38  ;;  %vm3484_vm4 = vmor %vm895_vm0, %vm896_vm3  ;;  %vm910_vm7 = vweird.f32 %v3428_v16  ;;  %vm3496_vm9 = vcmp.eq.f32.partialorder %v914_v47, 8.507059e+37  ;;  %vm925_vm12 = vweird.f32 %v3449_v13 }
 0x121   :  { %v892_v21 = vsub.f32 1.0, %v891_v34  ;;  %v3467_v63 = vpop.eup %2299  ;;  %v3477_v34 = vadd.f32 %v1362_v62, %v1361_v59  ;;  %vm881_vm5 = vweird.f32 %v2298_v46  ;;  %v887_v62 = vor.u32 1.1754944e-38, %v886_v58 }
 0x122   :  { %v2302_v32 = vpop.eup %2301  ;;  %v906_v7 = vmul.f32 %v3467_v63, %v3428_v16  ;;  %vm911_vm8 = vweird.f32 %v3467_v63  ;;  %2307 = vrcp.f32 %v3473_v23  ;;  %vm3509_vm10 = vmor %vm880_vm2, %vm881_vm5  ;;  %v917_v47 = vor.u32 1.1754944e-38, %v916_v49 }
 0x123   :  { %1170 = vadd.xlane.f32.xlu2 %v1169_v53  ;;  %1402 = vadd.xlane.f32.xlu0 %v1401_v36  ;;  %v876_v53 = vmul.f32 %v2298_v46, %v3420_v4  ;;  %v3470_v36 = vadd.f32 %v1330_v0, %v1329_v44  ;;  %v3494_v5 = vpop.eup %2303  ;;  %v3501_v25 = vadd.f32 1.0, %v2302_v32  ;;  %v295_v32 = vpop.f32.mrf.mxu1  ;;  %vm3522_vm11 = vmor %vm910_vm7, %vm911_vm8  ;;  %v931_v49 = vand.u32 2147483648, %v3449_v13 }
 0x124   :  { %1122 = vadd.xlane.f32.xlu1 %v1121_v24  ;;  %v893_v24 = vmul.f32 %v2294_v18, %v892_v21  ;;  %v907_v21 = vsub.f32 1.0, %v906_v7  ;;  %v182_v44 = vpop.f32.mrf.mxu0  ;;  %vm940_vm13 = vweird.f32 %v3451_v26  ;;  %vm926_vm14 = vweird.f32 %v3494_v5 }
 0x125   :  { %v877_v0 = vsub.f32 1.0, %v876_v53  ;;  %v3503_v53 = vpop.eup %2305  ;;  %v932_v60 = vor.u32 1.1754944e-38, %v931_v49  ;;  %vm3570_vm0 = vmor %vm925_vm12, %vm926_vm14  ;;  %2309 = vrcp.f32 %v3501_v25  ;;  %v959_v49 = vand.u32 2147483647, %v3473_v23 }
 0x126   :  { %v3475_v42 = vpop.xlane.xlu0 %1092  ;;  %v894_v59 = vadd.f32 %v2294_v18, %v893_v24  ;;  %v908_v58 = vmul.f32 %v3467_v63, %v907_v21  ;;  %vm941_vm15 = vweird.f32 %v3503_v53  ;;  %vm970_vm8 = vweird.f32 %v3501_v25 }
 0x127   :  { %v878_v52 = vmul.f32 %v2298_v46, %v877_v0  ;;  %v921_v0 = vmul.f32 %v3494_v5, %v3449_v13  ;;  %vm3593_vm2 = vmor %vm940_vm13, %vm941_vm15  ;;  %vm960_vm7 = vcmp.eq.f32.partialorder %v959_v49, 8.507059e+37 }
 0x128   :  { %v898_v24 = vsel %vm3484_vm4, %v2294_v18, %v894_v59  ;;  %v3534_v16 = vpop.xlane.xlu2 %1372  ;;  %v3549_v7 = vpop.eup %2307  ;;  %vm955_vm4 = vweird.f32 %v3473_v23 }
 0x129   :  { %v903_v39 = vsel %vm3456_vm1, %v902_v19, %v898_v24  ;;  %v879_v18 = vadd.f32 %v2298_v46, %v878_v52  ;;  %v909_v19 = vadd.f32 %v3467_v63, %v908_v58  ;;  %v922_v59 = vsub.f32 1.0, %v921_v0  ;;  %v343_v52 = vpop.f32.mrf.mxu3  ;;  %v230_v58 = vpop.f32.mrf.mxu2 }
 0x12a   :  { %v1020_v15 = vmul.f32 2.0, %v903_v39  ;;  %v929_v24 = vand.u32 2147483647, %v3449_v13  ;;  %v951_v12 = vmul.f32 %v3549_v7, %v3473_v23  ;;  %vm956_vm5 = vweird.f32 %v3549_v7 }
 0x12b   :  { %1173 = vadd.xlane.f32.xlu0 %v1172_v37  ;;  %1125 = vadd.xlane.f32.xlu2 %v1124_v17  ;;  %v936_v37 = vmul.f32 %v3503_v53, %v3451_v26  ;;  %v883_v21 = vsel %vm3509_vm10, %v2298_v46, %v879_v18  ;;  %v913_v0 = vsel %vm3522_vm11, %v3467_v63, %v909_v19  ;;  %v944_v46 = vand.u32 2147483647, %v3451_v26  ;;  %v3620_v55 = vpop.eup %2309 }
 0x12c   :  { %1450 = vadd.xlane.f32.xlu1 %v3436_v9  ;;  %v3530_v17 = vpop.xlane.xlu1 %1140  ;;  %v888_v39 = vsel %vm3488_vm6, %v887_v62, %v883_v21  ;;  %v3551_v18 = vmul.f32 %v1020_v15, %v295_v32  ;;  %v923_v31 = vmul.f32 %v3494_v5, %v922_v59  ;;  %v3554_v51 = vmul.f32 %v1020_v15, %v343_v52  ;;  %v185_v15 = vpop.f32.mrf.mxu0  ;;  %vm3634_vm6 = vmor %vm955_vm4, %vm956_vm5 }
 0x12d   :  { %v937_v20 = vsub.f32 1.0, %v936_v37  ;;  %v1019_v37 = vmul.f32 2.0, %v888_v39  ;;  %v946_v63 = vand.u32 2147483648, %v3451_v26  ;;  %v918_v32 = vsel %vm3496_vm9, %v917_v47, %v913_v0  ;;  %v298_v59 = vpop.f32.mrf.mxu1 }
 0x12e   :  { %v3540_v9 = vpop.xlane.xlu0 %1095  ;;  %4217 = vst [vmem:[#allocation36_spill] sm:$0xff] %v3551_v18  ;;  %v924_v19 = vadd.f32 %v3494_v5, %v923_v31  ;;  %vm3574_vm1 = vcmp.eq.f32.partialorder %v929_v24, 8.507059e+37  ;;  %v1332_v47 = vmul.f32 %v3551_v18, %v3551_v18  ;;  %vm3597_vm3 = vcmp.eq.f32.partialorder %v944_v46, 8.507059e+37 }
 0x12f   :  { %4218 = vst [vmem:[#allocation37_spill] sm:$0xff] %v3554_v51  ;;  %v938_v38 = vmul.f32 %v3503_v53, %v937_v20  ;;  %v3559_v62 = vmul.f32 %v1019_v37, %v182_v44  ;;  %v3561_v4 = vmul.f32 %v1019_v37, %v230_v58  ;;  %v1021_v52 = vmul.f32 2.0, %v918_v32 }
 0x130   :  { %v928_v24 = vsel %vm3570_vm0, %v3494_v5, %v924_v19  ;;  %v961_v39 = vand.u32 2147483648, %v3473_v23  ;;  %v1364_v0 = vmul.f32 %v3554_v51, %v3554_v51  ;;  %v947_v46 = vor.u32 1.1754944e-38, %v946_v63 }
 0x131   :  { %4219 = vst [vmem:[#allocation38_spill] sm:$0xff] %v3559_v62  ;;  %v939_v44 = vadd.f32 %v3503_v53, %v938_v38  ;;  %v1127_v31 = vadd.f32 %v3551_v18, %v3559_v62  ;;  %v1331_v13 = vmul.f32 %v3559_v62, %v3559_v62  ;;  %v1363_v58 = vmul.f32 %v3561_v4, %v3561_v4  ;;  %v233_v18 = vpop.f32.mrf.mxu2  ;;  %v386_v62 = vld [vmem:[#allocation7 + $0xf8] sm:$0xff]  ;;  %v346_v20 = vpop.f32.mrf.mxu3 }
 0x132   :  { %4220 = vst [vmem:[#allocation39_spill] sm:$0xff] %v3561_v4  ;;  %v952_v19 = vsub.f32 1.0, %v951_v12  ;;  %v3624_v63 = vmul.f32 %v1021_v52, %v185_v15  ;;  %v962_v21 = vor.u32 1.1754944e-38, %v961_v39  ;;  %v1187_v15 = vadd.f32 %v3540_v9, %v3475_v42 }
 0x133   :  { %1453 = vadd.xlane.f32.xlu2 %v3477_v34  ;;  %1128 = vadd.xlane.f32.xlu0 %v1127_v31  ;;  %v943_v32 = vsel %vm3593_vm2, %v3503_v53, %v939_v44  ;;  %v1407_v31 = vadd.f32 %v1332_v47, %v1331_v13  ;;  %v1455_v44 = vadd.f32 %v1364_v0, %v1363_v58  ;;  %v2134_v39 = vmul.f32 -1.442695, %v386_v62 }
 0x134   :  { %1405 = vadd.xlane.f32.xlu1 %v3470_v36  ;;  %v1144_v26 = vpop.xlane.xlu2 %1143  ;;  %v933_v36 = vsel %vm3574_vm1, %v932_v60, %v928_v24  ;;  %v1175_v60 = vadd.f32 %v3554_v51, %v3561_v4  ;;  %4229 = vst [vmem:[#allocation40_spill] sm:$0xff] %v3624_v63  ;;  %v953_v24 = vmul.f32 %v3549_v7, %v952_v19  ;;  %v1188_v0 = vrot.slane %v1187_v15, 4 }
 0x135   :  { %v1022_v5 = vmul.f32 2.0, %v933_v36  ;;  %v1243_v53 = vadd.f32 %v1144_v26, %v3530_v17  ;;  %v948_v13 = vsel %vm3597_vm3, %v947_v46, %v943_v32  ;;  %v3641_v17 = vmul.f32 %v1021_v52, %v233_v18  ;;  %v188_v18 = vpop.f32.mrf.mxu0  ;;  %v301_v62 = vpop.f32.mrf.mxu1 }
 0x136   :  { %v1421_v37 = vpop.xlane.xlu0 %1420  ;;  %v3613_v38 = vpop.xlane.xlu1 %1098  ;;  %v954_v36 = vadd.f32 %v3549_v7, %v953_v24  ;;  %v966_v34 = vmul.f32 %v3620_v55, %v3501_v25  ;;  %v1023_v23 = vmul.f32 2.0, %v948_v13  ;;  %v1333_v42 = vmul.f32 %v3624_v63, %v3624_v63 }
 0x137   :  { %v3628_v12 = vmul.f32 %v1022_v5, %v298_v59  ;;  %4233 = vst [vmem:[#allocation42_spill] sm:$0xff] %v3641_v17  ;;  %v3643_v59 = vmul.f32 %v1022_v5, %v346_v20  ;;  %v1244_v58 = vrot.slane %v1243_v53, 4  ;;  %2311 = vpow2.f32 %v2134_v39 }
 0x138   :  { %v958_v26 = vsel %vm3634_vm6, %v3549_v7, %v954_v36  ;;  %v3659_v20 = vmul.f32 %v1023_v23, %v188_v18  ;;  %v1189_v36 = vadd.f32 %v1188_v0, %v1187_v15  ;;  %vm971_vm9 = vweird.f32 %v3620_v55 }
 0x139   :  { %4230 = vst [vmem:[#allocation41_spill] sm:$0xff] %v3628_v12  ;;  %v1334_v9 = vmul.f32 %v3628_v12, %v3628_v12  ;;  %v963_v52 = vsel %vm960_vm7, %v962_v21, %v958_v26  ;;  %v1178_v49 = vadd.f32 %v3643_v59, %v3641_v17  ;;  %v236_v47 = vpop.f32.mrf.mxu2  ;;  %v1130_v39 = vadd.f32 %v3628_v12, %v3624_v63  ;;  %vm3683_vm10 = vmor %vm970_vm8, %vm971_vm9 }
 0x13a   :  { %4234 = vst [vmem:[#allocation43_spill] sm:$0xff] %v3643_v59  ;;  %v1024_v32 = vmul.f32 2.0, %v963_v52  ;;  %v3667_v18 = vmul.f32 %v1023_v23, %v236_v47  ;;  %v976_v23 = vand.u32 2147483648, %v3501_v25 }
 0x13b   :  { %1408 = vadd.xlane.f32.xlu2 %v1407_v31  ;;  %1456 = vadd.xlane.f32.xlu0 %v1455_v44  ;;  %v967_v31 = vsub.f32 1.0, %v966_v34  ;;  %4235 = vst [vmem:[#allocation44_spill] sm:$0xff] %v3659_v20  ;;  %v1245_v44 = vadd.f32 %v1244_v58, %v1243_v53  ;;  %v1410_v13 = vadd.f32 %v1334_v9, %v1333_v42 }
 0x13c   :  { %1176 = vadd.xlane.f32.xlu1 %v1175_v60  ;;  %v3661_v24 = vmul.f32 %v1024_v32, %v301_v62  ;;  %4237 = vst [vmem:[#allocation46_spill] sm:$0xff] %v3667_v18  ;;  %v1335_v53 = vmul.f32 %v3659_v20, %v3659_v20  ;;  %v1190_v62 = vrot.slane %v1189_v36, 2 }
 0x13d   :  { %v1246_v58 = vrot.slane %v1245_v44, 2 }
 0x13e   :  { %v3654_v46 = vpop.xlane.xlu2 %1426  ;;  %v1376_v5 = vpop.xlane.xlu0 %1375  ;;  %4236 = vst [vmem:[#allocation45_spill] sm:$0xff] %v3661_v24  ;;  %v1336_v15 = vmul.f32 %v3661_v24, %v3661_v24 }
 0x13f   :  { %v1467_v19 = vadd.f32 %v1376_v5, %v3534_v16  ;;  %v1424_v7 = vpop.xlane.xlu1 %1423  ;;  %v349_v16 = vpop.f32.mrf.mxu3  ;;  %v968_v5 = vmul.f32 %v3620_v55, %v967_v31  ;;  %v1247_v47 = vadd.f32 %v1246_v58, %v1245_v44 }
 0x140   :  { %v1523_v60 = vadd.f32 %v1424_v7, %v1421_v37  ;;  %v2312_v37 = vpop.eup %2311  ;;  %v3673_v42 = vmul.f32 %v1024_v32, %v349_v16  ;;  %v1191_v16 = vadd.f32 %v1190_v62, %v1189_v36 }
 0x141   :  { %v1468_v21 = vrot.slane %v1467_v19, 4  ;;  %v514_v9 = vadd.f32 1.0, %v2312_v37  ;;  %v969_v31 = vadd.f32 %v3620_v55, %v968_v5  ;;  %v977_v5 = vor.u32 1.1754944e-38, %v976_v23 }
 0x142   :  { %v1524_v26 = vrot.slane %v1523_v60, 4  ;;  %4238 = vst [vmem:[#allocation47_spill] sm:$0xff] %v3673_v42  ;;  %v1248_v51 = vrot.slane %v1247_v47, 1  ;;  %v1192_v58 = vrot.slane %v1191_v16, 1 }
 0x143   :  { %v1469_v52 = vadd.f32 %v1468_v21, %v1467_v19  ;;  %1179 = vadd.xlane.f32.xlu2 %v1178_v49  ;;  %1411 = vadd.xlane.f32.xlu0 %v1410_v13  ;;  %2313 = vrcp.f32 %v514_v9  ;;  %v1413_v13 = vadd.f32 %v1336_v15, %v1335_v53  ;;  %v973_v53 = vsel %vm3683_vm10, %v3620_v55, %v969_v31 }
 0x144   :  { %v1525_v34 = vadd.f32 %v1524_v26, %v1523_v60  ;;  %1131 = vadd.xlane.f32.xlu1 %v1130_v39  ;;  %v974_v60 = vand.u32 2147483647, %v3501_v25  ;;  %v1181_v26 = vadd.f32 %v3673_v42, %v3667_v18  ;;  %v1133_v39 = vadd.f32 %v3661_v24, %v3659_v20 }
 0x145   :  { %v1470_v7 = vrot.slane %v1469_v52, 2  ;;  %vm985_vm12 = vweird.f32 %v514_v9  ;;  %v989_v62 = vand.u32 2147483647, %v514_v9  ;;  %v991_v23 = vand.u32 2147483648, %v514_v9 }
 0x146   :  { %v3676_v0 = vpop.xlane.xlu0 %1146  ;;  %v1382_v19 = vpop.xlane.xlu2 %1381  ;;  %v1526_v21 = vrot.slane %v1525_v34, 2  ;;  %vm975_vm11 = vcmp.eq.f32.partialorder %v974_v60, 8.507059e+37 }
 0x147   :  { %v1379_v49 = vpop.xlane.xlu1 %1378  ;;  %v1471_v37 = vadd.f32 %v1470_v7, %v1469_v52  ;;  %v978_v4 = vsel %vm975_vm11, %v977_v5, %v973_v53  ;;  %v191_v5 = vpop.f32.mrf.mxu0  ;;  %vm990_vm15 = vcmp.eq.f32.partialorder %v989_v62, 8.507059e+37 }
 0x148   :  { %v1527_v25 = vadd.f32 %v1526_v21, %v1525_v34  ;;  %v1474_v44 = vadd.f32 %v1382_v19, %v1379_v49  ;;  %v1249_v19 = vadd.f32 %v1248_v51, %v1247_v47  ;;  %v304_v47 = vpop.f32.mrf.mxu1 }
 0x149   :  { %v2314_v15 = vpop.eup %2313  ;;  %v1472_v52 = vrot.slane %v1471_v37, 1 }
 0x14a   :  { %v981_v12 = vmul.f32 %v2314_v15, %v514_v9  ;;  %v1528_v31 = vrot.slane %v1527_v25, 1  ;;  %vm986_vm13 = vweird.f32 %v2314_v15  ;;  %v1475_v49 = vrot.slane %v1474_v44, 4 }
 0x14b   :  { %1134 = vadd.xlane.f32.xlu2 %v1133_v39  ;;  %1182 = vadd.xlane.f32.xlu0 %v1181_v26  ;;  %v1193_v39 = vadd.f32 %v1192_v58, %v1191_v16  ;;  %vm3699_vm14 = vmor %vm985_vm12, %vm986_vm13  ;;  %v1473_v24 = vadd.f32 %v1472_v52, %v1471_v37 }
 0x14c   :  { %1414 = vadd.xlane.f32.xlu1 %v1413_v13  ;;  %v982_v34 = vsub.f32 1.0, %v981_v12  ;;  %v1025_v13 = vmul.f32 2.0, %v978_v4  ;;  %v1529_v12 = vadd.f32 %v1528_v31, %v1527_v25  ;;  %v1476_v51 = vadd.f32 %v1475_v49, %v1474_v44 }
 0x14e   :  { %v1430_v63 = vpop.xlane.xlu0 %1429  ;;  %v3694_v36 = vpop.xlane.xlu2 %1104  ;;  %v983_v32 = vmul.f32 %v2314_v15, %v982_v34  ;;  %v3703_v34 = vmul.f32 %v1025_v13, %v191_v5  ;;  %v1579_v25 = vadd.f32 %v1529_v12, %v1473_v24  ;;  %v1365_v12 = vmul.f32 %v3641_v17, %v3641_v17 }
 0x14f   :  { %v1530_v7 = vadd.f32 %v1430_v63, %v3654_v46  ;;  %v1102_v55 = vpop.xlane.xlu1 %1101  ;;  %v992_v63 = vor.u32 1.1754944e-38, %v991_v23  ;;  %v352_v23 = vpop.f32.mrf.mxu3 }
 0x150   :  { %v1194_v60 = vadd.f32 %v1102_v55, %v3613_v38  ;;  %v984_v20 = vadd.f32 %v2314_v15, %v983_v32  ;;  %v1299_v38 = vadd.f32 %v1249_v19, %v1193_v39  ;;  %v239_v55 = vpop.f32.mrf.mxu2  ;;  %4243 = vst [vmem:[#allocation48_spill] sm:$0xff] %v3703_v34 }
 0x151   :  { %v1531_v21 = vrot.slane %v1530_v7, 4  ;;  %v3709_v62 = vmul.f32 %v1025_v13, %v239_v55  ;;  %v2440_v13 = vmov 0  }
 0x152   :  { %v1195_v26 = vrot.slane %v1194_v60, 4  ;;  %v988_v9 = vsel %vm3699_vm14, %v2314_v15, %v984_v20  ;;  %v3712_v31 = vmul.f32 0.00012207031, %v1299_v38  ;;  %v1337_v15 = vmul.f32 %v3703_v34, %v3703_v34  ;;  %2177 = vset.pattern.permute.xlu0 %v2440_v13  ;;  %2176 = vset.pattern.permute.xlu1 %v2440_v13 }
 0x153   :  { %v1532_v46 = vadd.f32 %v1531_v21, %v1530_v7  ;;  %v993_v45 = vsel %vm990_vm15, %v992_v63, %v988_v9  ;;  %4244 = vst [vmem:[#allocation49_spill] sm:$0xff] %v3709_v62  ;;  %2178 = vset.pattern.permute.xlu2 %v2440_v13 }
 0x154   :  { %v1196_v4 = vadd.f32 %v1195_v26, %v1194_v60  ;;  %v1026_v52 = vmul.f32 2.0, %v993_v45  ;;  %v1477_v60 = vrot.slane %v1476_v51, 2  ;;  %v1595_v26 = vmul.f32 0.00012207031, %v1579_v25 }
 0x155   :  { %v1533_v7 = vrot.slane %v1532_v46, 2  ;;  %v1603_v63 = vmul.f32 %v3712_v31, %v3712_v31 }
 0x156   :  { %v3707_v16 = vpop.xlane.xlu0 %1384  ;;  %v1153_v58 = vpop.xlane.xlu2 %1152  ;;  %v1197_v19 = vrot.slane %v1196_v4, 2  ;;  %v3714_v49 = vmul.f32 %v1026_v52, %v304_v47  ;;  %v3716_v20 = vmul.f32 %v1026_v52, %v352_v23  ;;  %v1478_v39 = vadd.f32 %v1477_v60, %v1476_v51 }
 0x157   :  { %v1150_v37 = vpop.xlane.xlu1 %1149  ;;  %v1534_v32 = vadd.f32 %v1533_v7, %v1532_v46  ;;  %v1366_v51 = vmul.f32 %v3643_v59, %v3643_v59  ;;  %v1611_v7 = vsub.f32 %v1595_v26, %v1603_v63 }
 0x158   :  { %v1250_v44 = vadd.f32 %v1150_v37, %v3676_v0  ;;  %4245 = vst [vmem:[#allocation50_spill] sm:$0xff] %v3714_v49  ;;  %v1184_v45 = vadd.f32 %v3716_v20, %v3709_v62  ;;  %v1338_v24 = vmul.f32 %v3714_v49, %v3714_v49  ;;  %v1136_v0 = vadd.f32 %v3714_v49, %v3703_v34 }
 0x159   :  { %4246 = vst [vmem:[#allocation51_spill] sm:$0xff] %v3716_v20  ;;  %v1198_v5 = vadd.f32 %v1197_v19, %v1196_v4  ;;  %v1535_v55 = vrot.slane %v1534_v32, 1  ;;  %v1369_v37 = vmul.f32 %v3709_v62, %v3709_v62  ;;  %v1370_v25 = vmul.f32 %v3716_v20, %v3716_v20 }
 0x15a   :  { %v1251_v21 = vrot.slane %v1250_v44, 4  ;;  %1185 = vadd.xlane.f32.xlu1 %v1184_v45  ;;  %v1416_v46 = vadd.f32 %v1338_v24, %v1337_v15  ;;  %1137 = vadd.xlane.f32.xlu0 %v1136_v0  ;;  %v3741_v13 = vadd.f32 1e-05, %v1611_v7  ;;  %v1458_v63 = vadd.f32 %v1366_v51, %v1365_v12 }
 0x15b   :  { %v1199_v60 = vrot.slane %v1198_v5, 1  ;;  %v1536_v45 = vadd.f32 %v1535_v55, %v1534_v32 }
 0x15c   :  { %v1252_v53 = vadd.f32 %v1251_v21, %v1250_v44  ;;  %1417 = vadd.xlane.f32.xlu2 %v1416_v46  ;;  %v1479_v44 = vrot.slane %v1478_v39, 1  ;;  %v1367_v21 = vmul.f32 %v3667_v18, %v3667_v18  ;;  %v1464_v46 = vadd.f32 %v1370_v25, %v1369_v37 }
 0x15d   :  { %2315 = vrsqrt.f32 %v3741_v13  ;;  %vm1633_vm4 = vweird.f32 %v3741_v13 }
 0x15e   :  { %v1156_v38 = vpop.xlane.xlu0 %1155  ;;  %v1108_v47 = vpop.xlane.xlu2 %1107  ;;  %v1253_v9 = vrot.slane %v1252_v53, 2 }
 0x15f   :  { %v1433_v4 = vpop.xlane.xlu1 %1432  ;;  %v1257_v23 = vadd.f32 %v1156_v38, %v1153_v58  ;;  %v1201_v52 = vadd.f32 %v1108_v47, %v3694_v36  ;;  %v1368_v58 = vmul.f32 %v3673_v42, %v3673_v42  ;;  %v1480_v36 = vadd.f32 %v1479_v44, %v1478_v39 }
 0x160   :  { %v1254_v19 = vadd.f32 %v1253_v9, %v1252_v53  ;;  %v1200_v47 = vadd.f32 %v1199_v60, %v1198_v5 }
 0x161   :  { %v1258_v15 = vrot.slane %v1257_v23, 4  ;;  %v1202_v26 = vrot.slane %v1201_v52, 4  ;;  %v1461_v9 = vadd.f32 %v1368_v58, %v1367_v21  ;;  %v1580_v42 = vadd.f32 %v1536_v45, %v1480_v36 }
 0x162   :  { %v1255_v24 = vrot.slane %v1254_v19, 1  ;;  %1459 = vadd.xlane.f32.xlu1 %v1458_v63  ;;  %1465 = vadd.xlane.f32.xlu0 %v1464_v46 }
 0x163   :  { %v1259_v0 = vadd.f32 %v1258_v15, %v1257_v23  ;;  %v1203_v38 = vadd.f32 %v1202_v26, %v1201_v52  ;;  %v1596_v52 = vmul.f32 0.00012207031, %v1580_v42  ;;  %v3749_v21 = vpop.eup %2315 }
 0x164   :  { %v1256_v59 = vadd.f32 %v1255_v24, %v1254_v19  ;;  %1462 = vadd.xlane.f32.xlu2 %v1461_v9  ;;  %v1628_v63 = vmul.f32 %v3749_v21, %v3741_v13  ;;  %vm1634_vm2 = vweird.f32 %v3749_v21 }
 0x165   :  { %v1260_v53 = vrot.slane %v1259_v0, 2  ;;  %v1204_v17 = vrot.slane %v1203_v38, 2  ;;  %vm3786_vm5 = vmor %vm1633_vm4, %vm1634_vm2 }
 0x166   :  { %v1436_v20 = vpop.xlane.xlu2 %1435  ;;  %v1111_v62 = vpop.xlane.xlu0 %1110  ;;  %v1300_v18 = vadd.f32 %v1256_v59, %v1200_v47 }
 0x167   :  { %v1261_v32 = vadd.f32 %v1260_v53, %v1259_v0  ;;  %v1388_v55 = vpop.xlane.xlu1 %1387  ;;  %v1537_v23 = vadd.f32 %v1436_v20, %v1433_v4  ;;  %v1205_v12 = vadd.f32 %v1204_v17, %v1203_v38  ;;  %v1629_v53 = vmul.f32 %v3749_v21, %v1628_v63 }
 0x168   :  { %v1481_v39 = vadd.f32 %v1388_v55, %v3707_v16  ;;  %v3745_v5 = vmul.f32 0.00012207031, %v1300_v18 }
 0x169   :  { %v1262_v51 = vrot.slane %v1261_v32, 1  ;;  %v1538_v7 = vrot.slane %v1537_v23, 4  ;;  %v1206_v37 = vrot.slane %v1205_v12, 1 }
 0x16a   :  { %v1482_v25 = vrot.slane %v1481_v39, 4  ;;  %v1604_v59 = vmul.f32 %v3745_v5, %v3745_v5 }
 0x16b   :  { %v1539_v44 = vadd.f32 %v1538_v7, %v1537_v23  ;;  %v1263_v60 = vadd.f32 %v1262_v51, %v1261_v32  ;;  %v1207_v19 = vadd.f32 %v1206_v37, %v1205_v12  ;;  %v2179_v32 = vld [vmem:[%s4047_s3 + $0x9] ss:$0 sm:$0xff] }
 0x16c   :  { %v1483_v20 = vadd.f32 %v1482_v25, %v1481_v39  ;;  %v1612_v15 = vsub.f32 %v1596_v52, %v1604_v59 }
 0x16d   :  { %v1540_v4 = vrot.slane %v1539_v44, 2  ;;  %v1301_v24 = vadd.f32 %v1263_v60, %v1207_v19  ;;  %v1630_v19 = vmul.f32 0.5, %v1629_v53 }
 0x16e   :  { %v1484_v17 = vrot.slane %v1483_v20, 2  ;;  %v1391_v16 = vpop.xlane.xlu2 %1390  ;;  %v1439_v18 = vpop.xlane.xlu0 %1438  ;;  %v1620_v45 = vadd.f32 1e-05, %v1612_v15 }
 0x16f   :  { %v1541_v58 = vadd.f32 %v1540_v4, %v1539_v44  ;;  %v1159_v26 = vpop.xlane.xlu1 %1158  ;;  %v3753_v36 = vmul.f32 0.00012207031, %v1301_v24  ;;  %v1631_v63 = vsub.f32 1.5, %v1630_v19 }
 0x170   :  { %v1485_v0 = vadd.f32 %v1484_v17, %v1483_v20  ;;  %2317 = vrsqrt.f32 %v1620_v45  ;;  %v2180_v17 = vld [vmem:[%s4047_s3 + $0x8] ss:$0 sm:$0xff]  ;;  %vm1643_vm1 = vweird.f32 %v1620_v45 }
 0x171   :  { %v1542_v42 = vrot.slane %v1541_v58, 1  ;;  %v1605_v37 = vmul.f32 %v3753_v36, %v3753_v36 }
 0x172   :  { %v1486_v46 = vrot.slane %v1485_v0, 1 }
 0x173   :  { %v1543_v38 = vadd.f32 %v1542_v42, %v1541_v58 }
 0x174   :  { %v1487_v47 = vadd.f32 %v1486_v46, %v1485_v0 }
 0x176   :  { %v1581_v9 = vadd.f32 %v1543_v38, %v1487_v47  ;;  %v1162_v55 = vpop.xlane.xlu2 %1161  ;;  %v1394_v23 = vpop.xlane.xlu0 %1393  ;;  %1928 = vperm.xlu0 %2177, %v2179_v32  }
 0x177   :  { %v2318_v12 = vpop.eup %2317  ;;  %v1264_v39 = vadd.f32 %v1162_v55, %v1159_v26  ;;  %v1488_v51 = vadd.f32 %v1394_v23, %v1391_v16  ;;  %v1114_v7 = vpop.xlane.xlu1 %1113 }
 0x178   :  { %v1597_v25 = vmul.f32 0.00012207031, %v1581_v9  ;;  %v1208_v52 = vadd.f32 %v1114_v7, %v1111_v62  ;;  %v1638_v44 = vmul.f32 %v2318_v12, %v1620_v45  ;;  %v2182_v62 = vld [vmem:[%s4047_s3 + $0xa] ss:$0 sm:$0xff]  ;;  %vm1644_vm0 = vweird.f32 %v2318_v12  ;;  %v2183_v9 = vld [vmem:[%s4047_s3 + $0xc] ss:$0 sm:$0xff] }
 0x179   :  { %v1265_v59 = vrot.slane %v1264_v39, 4  ;;  %v1489_v60 = vrot.slane %v1488_v51, 4  ;;  %vm1645_vm3 = vmor %vm1643_vm1, %vm1644_vm0 }
 0x17a   :  { %v1613_v20 = vsub.f32 %v1597_v25, %v1605_v37  ;;  %v1209_v4 = vrot.slane %v1208_v52, 4  ;;  %v1639_v15 = vmul.f32 %v2318_v12, %v1638_v44  ;;  %v1708_v37 = vld [vmem:[%s4047_s3 + $0x1] sm:$0x1] }
 0x17b   :  { %v1266_v58 = vadd.f32 %v1265_v59, %v1264_v39  ;;  %v1490_v26 = vadd.f32 %v1489_v60, %v1488_v51  ;;  %1924 = vperm.xlu1 %2176, %v2180_v17   ;;  %v1632_v59 = vmul.f32 %v3749_v21, %v1631_v63 }
 0x17c   :  { %v3764_v16 = vadd.f32 1e-05, %v1613_v20  ;;  %v1210_v24 = vadd.f32 %v1209_v4, %v1208_v52  ;;  %v1640_v0 = vmul.f32 0.5, %v1639_v15  ;;  %1932 = vperm.xlu2 %2178, %v2182_v62  }
 0x17d   :  { %v1267_v42 = vrot.slane %v1266_v58, 2  ;;  %v1491_v23 = vrot.slane %v1490_v26, 2 }
 0x17e   :  { %2319 = vrsqrt.f32 %v3764_v16  ;;  %v1211_v46 = vrot.slane %v1210_v24, 2  ;;  %v3770_v38 = vpop.xlane.xlu0 %1164  ;;  %v1117_v47 = vpop.xlane.xlu2 %1116  ;;  %v1641_v53 = vsub.f32 1.5, %v1640_v0  ;;  %1940 = vperm.xlu0 %2177, %v2183_v9   ;;  %v1636_v0 = vsel %vm3786_vm5, %v3749_v21, %v1632_v59 }
 0x17f   :  { %v1268_v32 = vadd.f32 %v1267_v42, %v1266_v58  ;;  %v1442_v55 = vpop.xlane.xlu1 %1441  ;;  %v1492_v4 = vadd.f32 %v1491_v23, %v1490_v26  ;;  %v1707_v26 = vld [vmem:[%s4047_s3] sm:$0x1]  ;;  %vm1653_vm7 = vweird.f32 %v3764_v16 }
 0x180   :  { %v1212_v39 = vadd.f32 %v1211_v46, %v1210_v24  ;;  %v1544_v51 = vadd.f32 %v1442_v55, %v1439_v18  ;;  %v1642_v7 = vmul.f32 %v2318_v12, %v1641_v53  ;;  %v2181_v18 = vld [vmem:[%s4047_s3 + $0xb] ss:$0 sm:$0xff]  ;;  %v1787_v23 = vmul.f32 %v1707_v26, %v1636_v0 }
 0x181   :  { %v1269_v25 = vrot.slane %v1268_v32, 1 }
 0x182   :  { %v1213_v52 = vrot.slane %v1212_v39, 1  ;;  %v1545_v44 = vrot.slane %v1544_v51, 4  ;;  %v1646_v60 = vsel %vm1645_vm3, %v2318_v12, %v1642_v7  ;;  %v1803_v59 = vperm.slane %v1787_v23, 0 }
 0x183   :  { %v1270_v45 = vadd.f32 %v1269_v25, %v1268_v32  ;;  %v1788_v19 = vmul.f32 %v1708_v37, %v1646_v60  ;;  %1936 = vperm.xlu1 %2176, %v2181_v18   ;;  %v1493_v32 = vrot.slane %v1492_v4, 1 }
 0x184   :  { %v2320_v20 = vpop.eup %2319  ;;  %v1214_v15 = vadd.f32 %v1213_v52, %v1212_v39  ;;  %v1546_v17 = vadd.f32 %v1545_v44, %v1544_v51 }
 0x185   :  { %v1804_v12 = vperm.slane %v1788_v19, 0  ;;  %v1648_v24 = vmul.f32 %v2320_v20, %v3764_v16  ;;  %vm1654_vm6 = vweird.f32 %v2320_v20  ;;  %v1494_v25 = vadd.f32 %v1493_v32, %v1492_v4 }
 0x186   :  { %v1547_v62 = vrot.slane %v1546_v17, 2  ;;  %v1445_v42 = vpop.xlane.xlu2 %1444  ;;  %v1120_v13 = vpop.xlane.xlu0 %1119  ;;  %v1302_v63 = vadd.f32 %v1270_v45, %v1214_v15  ;;  %vm1655_vm8 = vmor %vm1653_vm7, %vm1654_vm6 }
 0x187   :  { %v1397_v46 = vpop.xlane.xlu1 %1396  ;;  %v1215_v53 = vadd.f32 %v1120_v13, %v1117_v47  ;;  %v1649_v9 = vmul.f32 %v2320_v20, %v1648_v24  ;;  %1816 = vperm.xlu2 %2178, %v1804_v12   ;;  %v1709_v47 = vld [vmem:[%s4047_s3 + $0x2] sm:$0x1] }
 0x188   :  { %v1548_v55 = vadd.f32 %v1547_v62, %v1546_v17  ;;  %v3797_v37 = vmul.f32 0.00012207031, %v1302_v63 }
 0x189   :  { %v1216_v39 = vrot.slane %v1215_v53, 4  ;;  %v1650_v51 = vmul.f32 0.5, %v1649_v9 }
 0x18a   :  { %v1549_v7 = vrot.slane %v1548_v55, 1  ;;  %v1606_v15 = vmul.f32 %v3797_v37, %v3797_v37 }
 0x18b   :  { %v1651_v21 = vsub.f32 1.5, %v1650_v51  ;;  %v1217_v44 = vadd.f32 %v1216_v39, %v1215_v53  ;;  %1812 = vperm.xlu1 %2176, %v1803_v59  }
 0x18c   :  { %v1550_v52 = vadd.f32 %v1549_v7, %v1548_v55 }
 0x18d   :  { %v1652_v60 = vmul.f32 %v2320_v20, %v1651_v21  ;;  %v1218_v62 = vrot.slane %v1217_v44, 2 }
 0x18e   :  { %v1582_v45 = vadd.f32 %v1550_v52, %v1494_v25  ;;  %v1400_v18 = vpop.xlane.xlu2 %1399  ;;  %v1448_v19 = vpop.xlane.xlu0 %1447 }
 0x18f   :  { %v1168_v17 = vpop.xlane.xlu1 %1167  ;;  %v1495_v4 = vadd.f32 %v1400_v18, %v1397_v46  ;;  %v1551_v58 = vadd.f32 %v1448_v19, %v1445_v42  ;;  %v1656_v12 = vsel %vm1655_vm8, %v2320_v20, %v1652_v60  ;;  %v1219_v39 = vadd.f32 %v1218_v62, %v1217_v44 }
 0x190   :  { %v1598_v24 = vmul.f32 0.00012207031, %v1582_v45  ;;  %v1271_v16 = vadd.f32 %v1168_v17, %v3770_v38  ;;  %v1789_v0 = vmul.f32 %v1709_v47, %v1656_v12 }
 0x191   :  { %v1496_v26 = vrot.slane %v1495_v4, 4  ;;  %v1552_v13 = vrot.slane %v1551_v58, 4  ;;  %v1220_v59 = vrot.slane %v1219_v39, 1 }
 0x192   :  { %v1614_v63 = vsub.f32 %v1598_v24, %v1606_v15  ;;  %v1272_v53 = vrot.slane %v1271_v16, 4  ;;  %v1805_v9 = vperm.slane %v1789_v0, 0 }
 0x193   :  { %v1497_v32 = vadd.f32 %v1496_v26, %v1495_v4  ;;  %v1553_v55 = vadd.f32 %v1552_v13, %v1551_v58  ;;  %v1221_v44 = vadd.f32 %v1220_v59, %v1219_v39 }
 0x194   :  { %v1622_v23 = vadd.f32 1e-05, %v1614_v63  ;;  %v1273_v51 = vadd.f32 %v1272_v53, %v1271_v16  ;;  %1820 = vperm.xlu0 %2177, %v1805_v9  }
 0x195   :  { %v1498_v7 = vrot.slane %v1497_v32, 2  ;;  %v1554_v46 = vrot.slane %v1553_v55, 2 }
 0x196   :  { %2321 = vrsqrt.f32 %v1622_v23  ;;  %v1274_v20 = vrot.slane %v1273_v51, 2  ;;  %v1171_v42 = vpop.xlane.xlu2 %1170  ;;  %v1403_v21 = vpop.xlane.xlu0 %1402  ;;  %vm1663_vm10 = vweird.f32 %v1622_v23 }
 0x197   :  { %v1499_v25 = vadd.f32 %v1498_v7, %v1497_v32  ;;  %v1555_v38 = vadd.f32 %v1554_v46, %v1553_v55  ;;  %v1123_v52 = vpop.xlane.xlu1 %1122 }
 0x198   :  { %v1275_v60 = vadd.f32 %v1274_v20, %v1273_v51 }
 0x199   :  { %v1500_v47 = vrot.slane %v1499_v25, 1  ;;  %v1556_v45 = vrot.slane %v1555_v38, 1 }
 0x19a   :  { %v1276_v18 = vrot.slane %v1275_v60, 1 }
 0x19b   :  { %v1501_v19 = vadd.f32 %v1500_v47, %v1499_v25  ;;  %v1557_v15 = vadd.f32 %v1556_v45, %v1555_v38 }
 0x19c   :  { %v2322_v17 = vpop.eup %2321  ;;  %v1277_v4 = vadd.f32 %v1276_v18, %v1275_v60 }
 0x19d   :  { %v1658_v58 = vmul.f32 %v2322_v17, %v1622_v23  ;;  %v1583_v24 = vadd.f32 %v1557_v15, %v1501_v19  ;;  %vm1664_vm9 = vweird.f32 %v2322_v17 }
 0x19e   :  { %v1303_v12 = vadd.f32 %v1277_v4, %v1221_v44  ;;  %v1174_v62 = vpop.xlane.xlu0 %1173  ;;  %v1126_v16 = vpop.xlane.xlu2 %1125  ;;  %vm1665_vm11 = vmor %vm1663_vm10, %vm1664_vm9 }
 0x19f   :  { %v1278_v0 = vadd.f32 %v1174_v62, %v1171_v42  ;;  %v1451_v26 = vpop.xlane.xlu1 %1450  ;;  %v1222_v13 = vadd.f32 %v1126_v16, %v1123_v52  ;;  %v1659_v63 = vmul.f32 %v2322_v17, %v1658_v58  ;;  %v1599_v7 = vmul.f32 0.00012207031, %v1583_v24  ;;  %v1710_v52 = vld [vmem:[%s4047_s3 + $0x3] sm:$0x1] }
 0x1a0   :  { %v3806_v53 = vmul.f32 0.00012207031, %v1303_v12 }
 0x1a1   :  { %v1279_v9 = vrot.slane %v1278_v0, 4  ;;  %v1223_v32 = vrot.slane %v1222_v13, 4  ;;  %v1660_v55 = vmul.f32 0.5, %v1659_v63 }
 0x1a2   :  { %v1607_v51 = vmul.f32 %v3806_v53, %v3806_v53 }
 0x1a3   :  { %v1280_v39 = vadd.f32 %v1279_v9, %v1278_v0  ;;  %v1224_v46 = vadd.f32 %v1223_v32, %v1222_v13  ;;  %v1661_v20 = vsub.f32 1.5, %v1660_v55 }
 0x1a4   :  { %v1615_v25 = vsub.f32 %v1599_v7, %v1607_v51 }
 0x1a5   :  { %v1281_v38 = vrot.slane %v1280_v39, 2  ;;  %v1225_v59 = vrot.slane %v1224_v46, 2  ;;  %v1662_v42 = vmul.f32 %v2322_v17, %v1661_v20 }
 0x1a6   :  { %v1623_v60 = vadd.f32 1e-05, %v1615_v25  ;;  %v1454_v47 = vpop.xlane.xlu2 %1453  ;;  %v1129_v16 = vpop.xlane.xlu0 %1128 }
 0x1a7   :  { %v1282_v45 = vadd.f32 %v1281_v38, %v1280_v39  ;;  %v1226_v18 = vadd.f32 %v1225_v59, %v1224_v46  ;;  %v1406_v19 = vpop.xlane.xlu1 %1405  ;;  %v1558_v15 = vadd.f32 %v1454_v47, %v1451_v26  ;;  %v1666_v44 = vsel %vm1665_vm11, %v2322_v17, %v1662_v42 }
 0x1a8   :  { %2323 = vrsqrt.f32 %v1623_v60  ;;  %v1502_v4 = vadd.f32 %v1406_v19, %v1403_v21  ;;  %v1790_v58 = vmul.f32 %v1710_v52, %v1666_v44  ;;  %vm1673_vm13 = vweird.f32 %v1623_v60 }
 0x1a9   :  { %v1283_v12 = vrot.slane %v1282_v45, 1  ;;  %v1227_v24 = vrot.slane %v1226_v18, 1  ;;  %v1559_v62 = vrot.slane %v1558_v15, 4 }
 0x1aa   :  { %v1503_v23 = vrot.slane %v1502_v4, 4  ;;  %v1806_v0 = vperm.slane %v1790_v58, 0 }
 0x1ab   :  { %v1560_v13 = vadd.f32 %v1559_v62, %v1558_v15  ;;  %v1284_v63 = vadd.f32 %v1283_v12, %v1282_v45  ;;  %v1228_v9 = vadd.f32 %v1227_v24, %v1226_v18 }
 0x1ac   :  { %v1504_v32 = vadd.f32 %v1503_v23, %v1502_v4  ;;  %1824 = vperm.xlu2 %2178, %v1806_v0   ;;  %v1711_v4 = vld [vmem:[%s4047_s3 + $0x4] sm:$0x1] }
 0x1ad   :  { %v1561_v55 = vrot.slane %v1560_v13, 2  ;;  %v1304_v17 = vadd.f32 %v1284_v63, %v1228_v9 }
 0x1ae   :  { %v2324_v51 = vpop.eup %2323  ;;  %v1505_v7 = vrot.slane %v1504_v32, 2  ;;  %v3813_v42 = vpop.xlane.xlu0 %1456 }
 0x1af   :  { %v1562_v39 = vadd.f32 %v1561_v55, %v1560_v13  ;;  %v1668_v26 = vmul.f32 %v2324_v51, %v1623_v60  ;;  %v1177_v59 = vpop.xlane.xlu1 %1176  ;;  %v3815_v47 = vmul.f32 0.00012207031, %v1304_v17  ;;  %v1409_v18 = vpop.xlane.xlu2 %1408  ;;  %vm1674_vm12 = vweird.f32 %v2324_v51 }
 0x1b0   :  { %v1506_v46 = vadd.f32 %v1505_v7, %v1504_v32  ;;  %vm1675_vm14 = vmor %vm1673_vm13, %vm1674_vm12 }
 0x1b1   :  { %v1563_v21 = vrot.slane %v1562_v39, 1  ;;  %v1669_v20 = vmul.f32 %v2324_v51, %v1668_v26  ;;  %4249 = vst [vmem:[#allocation52_spill] sm:$0xff] %v3815_v47  ;;  %v1608_v58 = vmul.f32 %v3815_v47, %v3815_v47 }
 0x1b2   :  { %v1507_v25 = vrot.slane %v1506_v46, 1 }
 0x1b3   :  { %v1564_v38 = vadd.f32 %v1563_v21, %v1562_v39  ;;  %v1670_v52 = vmul.f32 0.5, %v1669_v20 }
 0x1b4   :  { %v1508_v45 = vadd.f32 %v1507_v25, %v1506_v46 }
 0x1b5   :  { %v1671_v19 = vsub.f32 1.5, %v1670_v52 }
 0x1b6   :  { %v1584_v15 = vadd.f32 %v1564_v38, %v1508_v45  ;;  %v1412_v63 = vpop.xlane.xlu0 %1411 }
 0x1b7   :  { %v1672_v44 = vmul.f32 %v2324_v51, %v1671_v19  ;;  %v1132_v9 = vpop.xlane.xlu1 %1131  ;;  %v1180_v32 = vpop.xlane.xlu2 %1179  ;;  %v1509_v45 = vadd.f32 %v1412_v63, %v1409_v18 }
 0x1b8   :  { %v1600_v12 = vmul.f32 0.00012207031, %v1584_v15  ;;  %v1285_v55 = vadd.f32 %v1180_v32, %v1177_v59  ;;  %v1229_v39 = vadd.f32 %v1132_v9, %v1129_v16  ;;  %v1712_v15 = vld [vmem:[%s4047_s3 + $0x5] sm:$0x1] }
 0x1b9   :  { %v1676_v24 = vsel %vm1675_vm14, %v2324_v51, %v1672_v44 }
 0x1ba   :  { %v1616_v62 = vsub.f32 %v1600_v12, %v1608_v58  ;;  %v1791_v23 = vmul.f32 %v1711_v4, %v1676_v24  ;;  %v1286_v21 = vrot.slane %v1285_v55, 4  ;;  %v1230_v51 = vrot.slane %v1229_v39, 4 }
 0x1bb   :  { %v1510_v58 = vrot.slane %v1509_v45, 4 }
 0x1bc   :  { %v1624_v0 = vadd.f32 1e-05, %v1616_v62  ;;  %v1807_v13 = vperm.slane %v1791_v23, 0  ;;  %v1287_v52 = vadd.f32 %v1286_v21, %v1285_v55  ;;  %v1231_v59 = vadd.f32 %v1230_v51, %v1229_v39 }
 0x1be   :  { %2325 = vrsqrt.f32 %v1624_v0  ;;  %1828 = vperm.xlu1 %2176, %v1807_v13   ;;  %v1183_v26 = vpop.xlane.xlu0 %1182  ;;  %vm1683_vm0 = vweird.f32 %v1624_v0  ;;  %v1288_v4 = vrot.slane %v1287_v52, 2  ;;  %v1232_v62 = vrot.slane %v1231_v59, 2 }
 0x1bf   :  { %v1415_v17 = vpop.xlane.xlu1 %1414  ;;  %v1135_v20 = vpop.xlane.xlu2 %1134 }
 0x1c0   :  { %v1289_v55 = vadd.f32 %v1288_v4, %v1287_v52 }
 0x1c4   :  { %v2326_v60 = vpop.eup %2325 }
 0x1c5   :  { %v1678_v7 = vmul.f32 %v2326_v60, %v1624_v0  ;;  %vm1684_vm15 = vweird.f32 %v2326_v60 }
 0x1c6   :  { %vm1685_vm1 = vmor %vm1683_vm0, %vm1684_vm15 }
 0x1c7   :  { %v1679_v46 = vmul.f32 %v2326_v60, %v1678_v7  ;;  %v1511_v7 = vadd.f32 %v1510_v58, %v1509_v45 }
 0x1c9   :  { %v1680_v25 = vmul.f32 0.5, %v1679_v46  ;;  %v1233_v46 = vadd.f32 %v1232_v62, %v1231_v59 }
 0x1cb   :  { %v1681_v38 = vsub.f32 1.5, %v1680_v25  ;;  %v2184_v25 = vld [vmem:[%s4047_s3 + $0xf] ss:$0 sm:$0xff] }
 0x1cc   :  { %1952 = vperm.xlu0 %2177, %v2184_v25  }
 0x1cd   :  { %v1682_v19 = vmul.f32 %v2326_v60, %v1681_v38  ;;  %v1186_v12 = vpop.xlane.xlu1 %1185  ;;  %v1138_v24 = vpop.xlane.xlu0 %1137 }
 0x1ce   :  { %v1292_v23 = vadd.f32 %v1186_v12, %v1183_v26  ;;  %v1236_v13 = vadd.f32 %v1138_v24, %v1135_v20  ;;  %v1290_v26 = vrot.slane %v1289_v55, 1  ;;  %v1512_v20 = vrot.slane %v1511_v7, 2 }
 0x1cf   :  { %v1686_v16 = vsel %vm1685_vm1, %v2326_v60, %v1682_v19  ;;  %v1418_v32 = vpop.xlane.xlu2 %1417 }
 0x1d0   :  { %v1792_v44 = vmul.f32 %v1712_v15, %v1686_v16  ;;  %v1293_v18 = vrot.slane %v1292_v23, 4  ;;  %v1516_v63 = vadd.f32 %v1418_v32, %v1415_v17  ;;  %v1237_v0 = vrot.slane %v1236_v13, 4 }
 0x1d1   :  { %v1234_v17 = vrot.slane %v1233_v46, 1 }
 0x1d2   :  { %v1808_v9 = vperm.slane %v1792_v44, 0  ;;  %v1294_v39 = vadd.f32 %v1293_v18, %v1292_v23  ;;  %v1517_v21 = vrot.slane %v1516_v63, 4  ;;  %v1238_v60 = vadd.f32 %v1237_v0, %v1236_v13 }
 0x1d3   :  { %v1291_v23 = vadd.f32 %v1290_v26, %v1289_v55  ;;  %v1513_v13 = vadd.f32 %v1512_v20, %v1511_v7 }
 0x1d4   :  { %1832 = vperm.xlu2 %2178, %v1808_v9   ;;  %v1295_v51 = vrot.slane %v1294_v39, 2  ;;  %v1239_v38 = vrot.slane %v1238_v60, 2  ;;  %v1518_v19 = vadd.f32 %v1517_v21, %v1516_v63  ;;  %v1235_v9 = vadd.f32 %v1234_v17, %v1233_v46 }
 0x1d5   :  { %v1460_v15 = vpop.xlane.xlu1 %1459  ;;  %v1466_v45 = vpop.xlane.xlu0 %1465 }
 0x1d6   :  { %v1296_v16 = vadd.f32 %v1295_v51, %v1294_v39  ;;  %v1240_v44 = vadd.f32 %v1239_v38, %v1238_v60  ;;  %v1565_v52 = vadd.f32 %v1460_v15, %v3813_v42  ;;  %v1519_v24 = vrot.slane %v1518_v19, 2 }
 0x1d7   :  { %v1463_v59 = vpop.xlane.xlu2 %1462  ;;  %v1514_v60 = vrot.slane %v1513_v13, 1  ;;  %v1305_v51 = vadd.f32 %v1291_v23, %v1235_v9 }
 0x1d8   :  { %v1297_v4 = vrot.slane %v1296_v16, 1  ;;  %v1241_v58 = vrot.slane %v1240_v44, 1  ;;  %v1566_v12 = vrot.slane %v1565_v52, 4  ;;  %v1572_v62 = vadd.f32 %v1466_v45, %v1463_v59 }
 0x1d9   :  { %v1520_v25 = vadd.f32 %v1519_v24, %v1518_v19  ;;  %v1515_v55 = vadd.f32 %v1514_v60, %v1513_v13  ;;  %v3831_v7 = vmul.f32 0.00012207031, %v1305_v51  ;;  %v1727_v19 = vsub.f32 %v2783_v6, %v3745_v5 }
 0x1da   :  { %v1567_v32 = vadd.f32 %v1566_v12, %v1565_v52  ;;  %v1298_v18 = vadd.f32 %v1297_v4, %v1296_v16  ;;  %v1242_v0 = vadd.f32 %v1241_v58, %v1240_v44  ;;  %v1573_v63 = vrot.slane %v1572_v62, 4 }
 0x1db   :  { %v1521_v34 = vrot.slane %v1520_v25, 1  ;;  %v1728_v16 = vsub.f32 %v2799_v10, %v3745_v5  ;;  %v1729_v59 = vsub.f32 %v2856_v22, %v3745_v5  ;;  %v1730_v4 = vsub.f32 %v2865_v57, %v3745_v5 }
 0x1dc   :  { %v1568_v21 = vrot.slane %v1567_v32, 2  ;;  %v1574_v39 = vadd.f32 %v1573_v63, %v1572_v62  ;;  %v1306_v38 = vadd.f32 %v1298_v18, %v1242_v0  ;;  %v1759_v12 = vsub.f32 %v2843_v41, %v3745_v5 }
 0x1dd   :  { %v1522_v44 = vadd.f32 %v1521_v34, %v1520_v25  ;;  %v1760_v6 = vsub.f32 %v2849_v48, %v3745_v5  ;;  %v1761_v22 = vsub.f32 %v2917_v33, %v3745_v5  ;;  %v1762_v57 = vsub.f32 %v2923_v8, %v3745_v5 }
 0x1de   :  { %v1569_v42 = vadd.f32 %v1568_v21, %v1567_v32  ;;  %v1575_v15 = vrot.slane %v1574_v39, 2  ;;  %v3833_v26 = vmul.f32 0.00012207031, %v1306_v38 }
 0x1df   :  { %v3829_v47 = vpop.permute.xlu2 %1932 }
 0x1e0   :  { %v1570_v49 = vrot.slane %v1569_v42, 1  ;;  %v1576_v45 = vadd.f32 %v1575_v15, %v1574_v39  ;;  %v1610_v10 = vmul.f32 %v3833_v26, %v3833_v26 }
 0x1e2   :  { %v1571_v46 = vadd.f32 %v1570_v49, %v1569_v42  ;;  %v1577_v20 = vrot.slane %v1576_v45, 1  ;;  %v1609_v49 = vmul.f32 %v3831_v7, %v3831_v7 }
 0x1e4   :  { %v1585_v17 = vadd.f32 %v1571_v46, %v1515_v55  ;;  %v1578_v52 = vadd.f32 %v1577_v20, %v1576_v45 }
 0x1e6   :  { %v1601_v58 = vmul.f32 0.00012207031, %v1585_v17  ;;  %v1586_v34 = vadd.f32 %v1578_v52, %v1522_v44 }
 0x1e7   :  { %v1817_v24 = vpop.permute.xlu2 %1816 }
 0x1e8   :  { %v1617_v62 = vsub.f32 %v1601_v58, %v1609_v49  ;;  %v1847_v23 = vmul.f32 %v1817_v24, %v1727_v19  ;;  %v1848_v13 = vmul.f32 %v1817_v24, %v1728_v16  ;;  %v1849_v9 = vmul.f32 %v1817_v24, %v1729_v59  ;;  %v1929_v32 = vpop.permute.xlu0 %1928 }
 0x1e9   :  { %v1602_v41 = vmul.f32 0.00012207031, %v1586_v34  ;;  %v1850_v18 = vmul.f32 %v1817_v24, %v1730_v4  ;;  %v1879_v0 = vmul.f32 %v1817_v24, %v1759_v12  ;;  %v1880_v48 = vmul.f32 %v1817_v24, %v1760_v6 }
 0x1ea   :  { %v1625_v63 = vadd.f32 1e-05, %v1617_v62  ;;  %v1881_v21 = vmul.f32 %v1817_v24, %v1761_v22  ;;  %v1882_v25 = vmul.f32 %v1817_v24, %v1762_v57  ;;  %v1959_v39 = vadd.f32 %v1929_v32, %v1847_v23 }
 0x1eb   :  { %v1618_v60 = vsub.f32 %v1602_v41, %v1610_v10  ;;  %v1960_v51 = vadd.f32 %v1929_v32, %v1848_v13  ;;  %v1961_v33 = vadd.f32 %v1929_v32, %v1849_v9  ;;  %v1962_v42 = vadd.f32 %v1929_v32, %v1850_v18 }
 0x1ec   :  { %2327 = vrsqrt.f32 %v1625_v63  ;;  %v1991_v8 = vadd.f32 %v1929_v32, %v1879_v0  ;;  %2023 = vst [vmem:[#allocation8 + $0x20] sm:$0xff] %v1959_v39  ;;  %v1992_v38 = vadd.f32 %v1929_v32, %v1880_v48  ;;  %v1993_v45 = vadd.f32 %v1929_v32, %v1881_v21 }
 0x1ed   :  { %v3855_v5 = vadd.f32 1e-05, %v1618_v60  ;;  %2024 = vst [vmem:[#allocation8 + $0x28] sm:$0xff] %v1960_v51  ;;  %v3857_v15 = vpop.permute.xlu1 %1924  ;;  %v1994_v55 = vadd.f32 %v1929_v32, %v1882_v25  ;;  %v1723_v49 = vsub.f32 %v2670_v1, %v3712_v31  ;;  %v1724_v58 = vsub.f32 %v2675_v3, %v3712_v31 }
 0x1ee   :  { %2025 = vst [vmem:[#allocation8 + $0x30] sm:$0xff] %v1961_v33  ;;  %v1725_v6 = vsub.f32 %v2740_v40, %v3712_v31  ;;  %v1726_v10 = vsub.f32 %v2742_v43, %v3712_v31  ;;  %v1755_v22 = vsub.f32 %v2723_v29, %v3712_v31  ;;  %v1756_v57 = vsub.f32 %v2732_v27, %v3712_v31  ;;  %v1714_v33 = vld [vmem:[%s4047_s3 + $0x7] sm:$0x1] }
 0x1ef   :  { %2329 = vrsqrt.f32 %v3855_v5  ;;  %2026 = vst [vmem:[#allocation8 + $0x38] sm:$0xff] %v1962_v42  ;;  %v1757_v1 = vsub.f32 %v2770_v61, %v3712_v31  ;;  %v1758_v3 = vsub.f32 %v2777_v2, %v3712_v31  ;;  %vm1693_vm3 = vweird.f32 %v1625_v63 }
 0x1f0   :  { %2055 = vst [vmem:[#allocation8 + $0x120] sm:$0xff] %v1991_v8  ;;  %v3883_v62 = vpop.permute.xlu0 %1940  ;;  %v1735_v43 = vsub.f32 %v3075_v54, %v3797_v37  ;;  %v1736_v29 = vsub.f32 %v3094_v11, %v3797_v37  ;;  %v1713_v54 = vld [vmem:[%s4047_s3 + $0x6] sm:$0x1]  ;;  %v1737_v21 = vsub.f32 %v3153_v50, %v3797_v37  ;;  %v1738_v25 = vsub.f32 %v3155_v35, %v3797_v37 }
 0x1f1   :  { %2056 = vst [vmem:[#allocation8 + $0x128] sm:$0xff] %v1992_v38  ;;  %vm1703_vm6 = vweird.f32 %v3855_v5  ;;  %v1767_v50 = vsub.f32 %v3113_v14, %v3797_v37  ;;  %v1769_v14 = vsub.f32 %v3162_v28, %v3797_v37 }
 0x1f2   :  { %v2328_v46 = vpop.eup %2327  ;;  %2057 = vst [vmem:[#allocation8 + $0x130] sm:$0xff] %v1993_v45 }
 0x1f3   :  { %2058 = vst [vmem:[#allocation8 + $0x138] sm:$0xff] %v1994_v55  ;;  %v1688_v20 = vmul.f32 %v2328_v46, %v1625_v63  ;;  %vm1694_vm2 = vweird.f32 %v2328_v46 }
 0x1f4   :  { %vm3890_vm4 = vmor %vm1693_vm3, %vm1694_vm2 }
 0x1f5   :  { %v3860_v17 = vpop.eup %2329  ;;  %v3862_v19 = vpop.permute.xlu1 %1936  ;;  %v1689_v16 = vmul.f32 %v2328_v46, %v1688_v20 }
 0x1f6   :  { %v1698_v44 = vmul.f32 %v3860_v17, %v3855_v5  ;;  %vm1704_vm5 = vweird.f32 %v3860_v17 }
 0x1f7   :  { %v1690_v52 = vmul.f32 0.5, %v1689_v16  ;;  %vm1705_vm7 = vmor %vm1703_vm6, %vm1704_vm5 }
 0x1f8   :  { %v1699_v59 = vmul.f32 %v3860_v17, %v1698_v44  ;;  %v1768_v44 = vsub.f32 %v3115_v56, %v3797_v37 }
 0x1f9   :  { %v1691_v4 = vsub.f32 1.5, %v1690_v52 }
 0x1fa   :  { %v1700_v12 = vmul.f32 0.5, %v1699_v59 }
 0x1fb   :  { %v1692_v34 = vmul.f32 %v2328_v46, %v1691_v4 }
 0x1fc   :  { %v1701_v40 = vsub.f32 1.5, %v1700_v12 }
 0x1fd   :  { %v1813_v24 = vpop.permute.xlu1 %1812  ;;  %v1696_v32 = vsel %vm3890_vm4, %v2328_v46, %v1692_v34 }
 0x1fe   :  { %v1843_v23 = vmul.f32 %v1813_v24, %v1723_v49  ;;  %v1844_v13 = vmul.f32 %v1813_v24, %v1724_v58  ;;  %v1845_v27 = vmul.f32 %v1813_v24, %v1725_v6  ;;  %v1846_v9 = vmul.f32 %v1813_v24, %v1726_v10  ;;  %v4252_v10 = vld [vmem:[#allocation12_spill] sm:$0xff] }
 0x1ff   :  { %v1875_v2 = vmul.f32 %v1813_v24, %v1755_v22  ;;  %v1876_v31 = vmul.f32 %v1813_v24, %v1756_v57  ;;  %v1877_v11 = vmul.f32 %v1813_v24, %v1757_v1  ;;  %v1878_v48 = vmul.f32 %v1813_v24, %v1758_v3  ;;  %v4253_v57 = vld [vmem:[#allocation13_spill] sm:$0xff]  ;;  %v4254_v3 = vld [vmem:[#allocation16_spill] sm:$0xff] }
 0x200   :  { %v1955_v41 = vadd.f32 %v3857_v15, %v1843_v23  ;;  %v1956_v18 = vadd.f32 %v3857_v15, %v1844_v13  ;;  %v1957_v0 = vadd.f32 %v3857_v15, %v1845_v27  ;;  %v1958_v63 = vadd.f32 %v3857_v15, %v1846_v9  ;;  %v4256_v9 = vld [vmem:[#allocation14_spill] sm:$0xff] }
 0x201   :  { %v1987_v39 = vadd.f32 %v3857_v15, %v1875_v2  ;;  %v1793_v60 = vmul.f32 %v1713_v54, %v1696_v32  ;;  %v1702_v51 = vmul.f32 %v3860_v17, %v1701_v40  ;;  %v1988_v8 = vadd.f32 %v3857_v15, %v1876_v31  ;;  %v2186_v31 = vld [vmem:[%s4047_s3 + $0xd] ss:$0 sm:$0xff]  ;;  %v4257_v54 = vld [vmem:[#allocation15_spill] sm:$0xff] }
 0x202   :  { %2019 = vst [vmem:[#allocation8] sm:$0xff] %v1955_v41  ;;  %v1989_v45 = vadd.f32 %v3857_v15, %v1877_v11  ;;  %v1990_v20 = vadd.f32 %v3857_v15, %v1878_v48  ;;  %v1731_v34 = vsub.f32 %v4252_v10, %v3753_v36  ;;  %v1732_v1 = vsub.f32 %v4253_v57, %v3753_v36 }
 0x203   :  { %2020 = vst [vmem:[#allocation8 + $0x8] sm:$0xff] %v1956_v18  ;;  %v1809_v5 = vperm.slane %v1793_v60, 0  ;;  %v1706_v55 = vsel %vm1705_vm7, %v3860_v17, %v1702_v51  ;;  %v1770_v17 = vsub.f32 %v3176_v30, %v3797_v37  ;;  %v2185_v30 = vld [vmem:[%s4047_s3 + $0xe] ss:$0 sm:$0xff]  ;;  %v1733_v24 = vsub.f32 %v4254_v3, %v3753_v36  ;;  %v4258_v18 = vld [vmem:[#allocation18_spill] sm:$0xff]  ;;  %s2441_s3 = smov [#allocation8]  }
 0x204   :  { %2021 = vst [vmem:[#allocation8 + $0x10] sm:$0xff] %v1957_v0  ;;  %v1794_v16 = vmul.f32 %v1714_v33, %v1706_v55  ;;  %v1763_v61 = vsub.f32 %v4256_v9, %v3753_v36  ;;  %v1764_v11 = vsub.f32 %v4257_v54, %v3753_v36  ;;  %v1765_v0 = vsub.f32 %v4258_v18, %v3753_v36  ;;  %s2087_s10 = sshll.u32 %s2441_s3, 4  ;;  %s2088_s10 = int_to_ptr.vmem [resolvable:$true] %s2087_s10 }
 0x205   :  { %2022 = vst [vmem:[#allocation8 + $0x18] sm:$0xff] %v1958_v63  ;;  %1836 = vperm.xlu1 %2176, %v1809_v5   ;;  %v4261_v5 = vld [vmem:[#allocation23_spill] sm:$0xff] }
 0x206   :  { %v1825_v42 = vpop.permute.xlu2 %1824  ;;  %2051 = vst [vmem:[#allocation8 + $0x100] sm:$0xff] %v1987_v39  ;;  %v1810_v49 = vperm.slane %v1794_v16, 0  ;;  %v1821_v12 = vpop.permute.xlu0 %1820  ;;  %v1740_v55 = vsub.f32 %v4261_v5, %v3806_v53  ;;  %v4263_v16 = vld [vmem:[#allocation25_spill] sm:$0xff] }
 0x207   :  { %v1855_v35 = vmul.f32 %v1825_v42, %v1735_v43  ;;  %v1856_v38 = vmul.f32 %v1825_v42, %v1736_v29  ;;  %v1857_v46 = vmul.f32 %v1825_v42, %v1737_v21  ;;  %v1858_v52 = vmul.f32 %v1825_v42, %v1738_v25  ;;  %2052 = vst [vmem:[#allocation8 + $0x108] sm:$0xff] %v1988_v8  ;;  %v4255_v29 = vld [vmem:[#allocation17_spill] sm:$0xff]  ;;  %v4259_v21 = vld [vmem:[#allocation19_spill] sm:$0xff] }
 0x208   :  { %v1887_v59 = vmul.f32 %v1825_v42, %v1767_v50  ;;  %v1888_v15 = vmul.f32 %v1825_v42, %v1768_v44  ;;  %2053 = vst [vmem:[#allocation8 + $0x110] sm:$0xff] %v1989_v45  ;;  %v1889_v56 = vmul.f32 %v1825_v42, %v1769_v14  ;;  %1840 = vperm.xlu2 %2178, %v1810_v49   ;;  %v4265_v14 = vld [vmem:[#allocation22_spill] sm:$0xff] }
 0x209   :  { %v1967_v4 = vadd.f32 %v3862_v19, %v1855_v35  ;;  %v1968_v58 = vadd.f32 %v3862_v19, %v1856_v38  ;;  %v1969_v6 = vadd.f32 %v3862_v19, %v1857_v46  ;;  %2054 = vst [vmem:[#allocation8 + $0x118] sm:$0xff] %v1990_v20  ;;  %v1890_v28 = vmul.f32 %v1825_v42, %v1770_v17  ;;  %v4260_v38 = vld [vmem:[#allocation20_spill] sm:$0xff] }
 0x20a   :  { %v1970_v22 = vadd.f32 %v3862_v19, %v1858_v52  ;;  %v1999_v37 = vadd.f32 %v3862_v19, %v1887_v59  ;;  %v1851_v40 = vmul.f32 %v1821_v12, %v1731_v34  ;;  %v2000_v43 = vadd.f32 %v3862_v19, %v1888_v15  ;;  %v4262_v46 = vld [vmem:[#allocation24_spill] sm:$0xff]  ;;  %v4264_v52 = vld [vmem:[#allocation21_spill] sm:$0xff] }
 0x20b   :  { %2031 = vst [vmem:[#allocation8 + $0x60] sm:$0xff] %v1967_v4  ;;  %v1734_v23 = vsub.f32 %v4255_v29, %v3753_v36  ;;  %v1852_v13 = vmul.f32 %v1821_v12, %v1732_v1  ;;  %v2001_v27 = vadd.f32 %v3862_v19, %v1889_v56  ;;  %v1853_v2 = vmul.f32 %v1821_v12, %v1733_v24  ;;  %v4266_v4 = vld [vmem:[#allocation26_spill] sm:$0xff] }
 0x20c   :  { %2032 = vst [vmem:[#allocation8 + $0x68] sm:$0xff] %v1968_v58  ;;  %v2002_v32 = vadd.f32 %v3862_v19, %v1890_v28  ;;  %v1883_v48 = vmul.f32 %v1821_v12, %v1763_v61  ;;  %v1963_v63 = vadd.f32 %v3829_v47, %v1851_v40  ;;  %v1766_v25 = vsub.f32 %v4259_v21, %v3753_v36  ;;  %v4270_v61 = vld [vmem:[#allocation48_spill] sm:$0xff] }
 0x20d   :  { %2033 = vst [vmem:[#allocation8 + $0x70] sm:$0xff] %v1969_v6  ;;  %v1854_v41 = vmul.f32 %v1821_v12, %v1734_v23  ;;  %1948 = vperm.xlu1 %2176, %v2185_v30   ;;  %v1884_v39 = vmul.f32 %v1821_v12, %v1764_v11  ;;  %v1964_v19 = vadd.f32 %v3829_v47, %v1852_v13  ;;  %v4267_v6 = vld [vmem:[#allocation27_spill] sm:$0xff]  ;;  %v4268_v23 = vld [vmem:[#allocation44_spill] sm:$0xff] }
 0x20e   :  { %2034 = vst [vmem:[#allocation8 + $0x78] sm:$0xff] %v1970_v22  ;;  %v1885_v60 = vmul.f32 %v1821_v12, %v1765_v0  ;;  %v1965_v51 = vadd.f32 %v3829_v47, %v1853_v2  ;;  %v1886_v33 = vmul.f32 %v1821_v12, %v1766_v25  ;;  %v1995_v8 = vadd.f32 %v3829_v47, %v1883_v48  ;;  %v4274_v0 = vld [vmem:[#allocation49_spill] sm:$0xff] }
 0x20f   :  { %2063 = vst [vmem:[#allocation8 + $0x160] sm:$0xff] %v1999_v37  ;;  %v1966_v42 = vadd.f32 %v3829_v47, %v1854_v41  ;;  %v1996_v50 = vadd.f32 %v3829_v47, %v1884_v39  ;;  %v1739_v45 = vsub.f32 %v4260_v38, %v3806_v53  ;;  %v1741_v20 = vsub.f32 %v4262_v46, %v3806_v53  ;;  %v4273_v41 = vld [vmem:[#allocation47_spill] sm:$0xff]  ;;  %v4277_v46 = vld [vmem:[#allocation28_spill] sm:$0xff] }
 0x210   :  { %2064 = vst [vmem:[#allocation8 + $0x168] sm:$0xff] %v2000_v43  ;;  %1944 = vperm.xlu2 %2178, %v2186_v31   ;;  %v1997_v36 = vadd.f32 %v3829_v47, %v1885_v60  ;;  %v1998_v35 = vadd.f32 %v3829_v47, %v1886_v33  ;;  %v1742_v44 = vsub.f32 %v4263_v16, %v3806_v53  ;;  %v4271_v31 = vld [vmem:[#allocation50_spill] sm:$0xff]  ;;  %v4275_v60 = vld [vmem:[#allocation51_spill] sm:$0xff] }
 0x211   :  { %2065 = vst [vmem:[#allocation8 + $0x170] sm:$0xff] %v2001_v27  ;;  %v1771_v47 = vsub.f32 %v4264_v52, %v3806_v53  ;;  %v1772_v59 = vsub.f32 %v4265_v14, %v3806_v53  ;;  %v1773_v49 = vsub.f32 %v4266_v4, %v3806_v53  ;;  %v1774_v10 = vsub.f32 %v4267_v6, %v3806_v53  ;;  %v4269_v27 = vld [vmem:[#allocation45_spill] sm:$0xff] }
 0x212   :  { %2066 = vst [vmem:[#allocation8 + $0x178] sm:$0xff] %v2002_v32  ;;  %v1751_v13 = vsub.f32 %v4268_v23, %v3833_v26  ;;  %v1752_v9 = vsub.f32 %v4269_v27, %v3833_v26  ;;  %v1753_v2 = vsub.f32 %v4270_v61, %v3833_v26  ;;  %v1754_v32 = vsub.f32 %v4271_v31, %v3833_v26 }
 0x213   :  { %2027 = vst [vmem:[#allocation8 + $0x40] sm:$0xff] %v1963_v63  ;;  %v1784_v18 = vsub.f32 %v4273_v41, %v3833_v26  ;;  %v1785_v48 = vsub.f32 %v4274_v0, %v3833_v26  ;;  %v4287_v41 = vld [vmem:[#allocation40_spill] sm:$0xff] }
 0x214   :  { %2028 = vst [vmem:[#allocation8 + $0x48] sm:$0xff] %v1964_v19 }
 0x215   :  { %2029 = vst [vmem:[#allocation8 + $0x50] sm:$0xff] %v1965_v51  ;;  %v1786_v51 = vsub.f32 %v4275_v60, %v3833_v26 }
 0x216   :  { %2030 = vst [vmem:[#allocation8 + $0x58] sm:$0xff] %v1966_v42 }
 0x217   :  { %2059 = vst [vmem:[#allocation8 + $0x140] sm:$0xff] %v1995_v8 }
 0x218   :  { %2060 = vst [vmem:[#allocation8 + $0x148] sm:$0xff] %v1996_v50 }
 0x219   :  { %2061 = vst [vmem:[#allocation8 + $0x150] sm:$0xff] %v1997_v36 }
 0x21a   :  { %2062 = vst [vmem:[#allocation8 + $0x158] sm:$0xff] %v1998_v35 }
 0x22e   :  { %v1833_v29 = vpop.permute.xlu2 %1832 }
 0x230   :  { %v1829_v17 = vpop.permute.xlu1 %1828 }
 0x231   :  { %v1859_v15 = vmul.f32 %v1829_v17, %v1739_v45  ;;  %v1860_v58 = vmul.f32 %v1829_v17, %v1740_v55  ;;  %v1861_v12 = vmul.f32 %v1829_v17, %v1741_v20  ;;  %v1862_v56 = vmul.f32 %v1829_v17, %v1742_v44  ;;  %v4276_v55 = vld [vmem:[#allocation52_spill] sm:$0xff]  ;;  %v4278_v44 = vld [vmem:[#allocation30_spill] sm:$0xff] }
 0x232   :  { %v1891_v34 = vmul.f32 %v1829_v17, %v1771_v47  ;;  %v1892_v28 = vmul.f32 %v1829_v17, %v1772_v59  ;;  %v1893_v22 = vmul.f32 %v1829_v17, %v1773_v49  ;;  %v1894_v37 = vmul.f32 %v1829_v17, %v1774_v10  ;;  %v4280_v49 = vld [vmem:[#allocation34_spill] sm:$0xff] }
 0x233   :  { %v1971_v57 = vadd.f32 %v3883_v62, %v1859_v15  ;;  %v1972_v1 = vadd.f32 %v3883_v62, %v1860_v58  ;;  %v1973_v30 = vadd.f32 %v3883_v62, %v1861_v12  ;;  %v1974_v3 = vadd.f32 %v3883_v62, %v1862_v56  ;;  %v4281_v12 = vld [vmem:[#allocation29_spill] sm:$0xff] }
 0x234   :  { %v2003_v24 = vadd.f32 %v3883_v62, %v1891_v34  ;;  %v2004_v40 = vadd.f32 %v3883_v62, %v1892_v28  ;;  %v2005_v53 = vadd.f32 %v3883_v62, %v1893_v22  ;;  %v2006_v43 = vadd.f32 %v3883_v62, %v1894_v37  ;;  %v4272_v62 = vld [vmem:[#allocation46_spill] sm:$0xff]  ;;  %v4282_v34 = vld [vmem:[#allocation31_spill] sm:$0xff] }
 0x235   :  { %2035 = vst [vmem:[#allocation8 + $0x80] sm:$0xff] %v1971_v57  ;;  %v1783_v11 = vsub.f32 %v4272_v62, %v3833_v26  ;;  %v1743_v20 = vsub.f32 %v4277_v46, %v4276_v55  ;;  %v1744_v52 = vsub.f32 %v4278_v44, %v4276_v55  ;;  %v4279_v26 = vld [vmem:[#allocation35_spill] sm:$0xff]  ;;  %v1746_v17 = vsub.f32 %v4280_v49, %v4276_v55  ;;  %v4286_v62 = vld [vmem:[#allocation36_spill] sm:$0xff] }
 0x236   :  { %2036 = vst [vmem:[#allocation8 + $0x88] sm:$0xff] %v1972_v1  ;;  %v1745_v14 = vsub.f32 %v4279_v26, %v4276_v55  ;;  %v1775_v56 = vsub.f32 %v4281_v12, %v4276_v55  ;;  %v1776_v28 = vsub.f32 %v4282_v34, %v4276_v55  ;;  %v4283_v1 = vld [vmem:[#allocation32_spill] sm:$0xff] }
 0x237   :  { %2037 = vst [vmem:[#allocation8 + $0x90] sm:$0xff] %v1973_v30  ;;  %v1863_v59 = vmul.f32 %v1833_v29, %v1743_v20  ;;  %v1864_v15 = vmul.f32 %v1833_v29, %v1744_v52  ;;  %v1866_v22 = vmul.f32 %v1833_v29, %v1746_v17  ;;  %v1777_v30 = vsub.f32 %v4283_v1, %v4276_v55 }
 0x238   :  { %2038 = vst [vmem:[#allocation8 + $0x98] sm:$0xff] %v1974_v3  ;;  %v1865_v6 = vmul.f32 %v1833_v29, %v1745_v14  ;;  %v1895_v37 = vmul.f32 %v1833_v29, %v1775_v56 }
 0x239   :  { %2067 = vst [vmem:[#allocation8 + $0x180] sm:$0xff] %v2003_v24  ;;  %v4284_v24 = vld [vmem:[#allocation33_spill] sm:$0xff]  ;;  %v1897_v23 = vmul.f32 %v1833_v29, %v1777_v30 }
 0x23a   :  { %2068 = vst [vmem:[#allocation8 + $0x188] sm:$0xff] %v2004_v40  ;;  %v1778_v40 = vsub.f32 %v4284_v24, %v4276_v55 }
 0x23b   :  { %2069 = vst [vmem:[#allocation8 + $0x190] sm:$0xff] %v2005_v53  ;;  %v1896_v53 = vmul.f32 %v1833_v29, %v1776_v28 }
 0x23c   :  { %2070 = vst [vmem:[#allocation8 + $0x198] sm:$0xff] %v2006_v43  ;;  %v1898_v27 = vmul.f32 %v1833_v29, %v1778_v40  ;;  %v1749_v29 = vsub.f32 %v4287_v41, %v3831_v7 }
 0x23e   :  { %v1953_v63 = vpop.permute.xlu0 %1952 }
 0x262   :  { %v1841_v54 = vpop.permute.xlu2 %1840 }
 0x263   :  { %v1871_v21 = vmul.f32 %v1841_v54, %v1751_v13  ;;  %v1872_v25 = vmul.f32 %v1841_v54, %v1752_v9  ;;  %v1873_v39 = vmul.f32 %v1841_v54, %v1753_v2  ;;  %v1874_v19 = vmul.f32 %v1841_v54, %v1754_v32  ;;  %v4285_v32 = vld [vmem:[#allocation38_spill] sm:$0xff] }
 0x264   :  { %v1903_v33 = vmul.f32 %v1841_v54, %v1783_v11  ;;  %v1904_v42 = vmul.f32 %v1841_v54, %v1784_v18  ;;  %v1905_v8 = vmul.f32 %v1841_v54, %v1785_v48  ;;  %v1906_v38 = vmul.f32 %v1841_v54, %v1786_v51  ;;  %v4288_v18 = vld [vmem:[#allocation41_spill] sm:$0xff]  ;;  %v4289_v48 = vld [vmem:[#allocation39_spill] sm:$0xff]  ;;  %v4291_v51 = vld [vmem:[#allocation42_spill] sm:$0xff] }
 0x265   :  { %v1983_v50 = vadd.f32 %v1953_v63, %v1871_v21  ;;  %v1984_v36 = vadd.f32 %v1953_v63, %v1872_v25  ;;  %v1985_v35 = vadd.f32 %v1953_v63, %v1873_v39  ;;  %v1986_v45 = vadd.f32 %v1953_v63, %v1874_v19  ;;  %v4290_v19 = vld [vmem:[#allocation37_spill] sm:$0xff] }
 0x266   :  { %v2015_v5 = vadd.f32 %v1953_v63, %v1903_v33  ;;  %v2016_v16 = vadd.f32 %v1953_v63, %v1904_v42  ;;  %v2017_v47 = vadd.f32 %v1953_v63, %v1905_v8  ;;  %v2018_v4 = vadd.f32 %v1953_v63, %v1906_v38 }
 0x267   :  { %2047 = vst [vmem:[#allocation8 + $0xe0] sm:$0xff] %v1983_v50  ;;  %v1747_v54 = vsub.f32 %v4285_v32, %v3831_v7  ;;  %v1748_v11 = vsub.f32 %v4286_v62, %v3831_v7  ;;  %v1750_v0 = vsub.f32 %v4288_v18, %v3831_v7  ;;  %v1779_v63 = vsub.f32 %v4289_v48, %v3831_v7 }
 0x268   :  { %2048 = vst [vmem:[#allocation8 + $0xe8] sm:$0xff] %v1984_v36  ;;  %v1780_v60 = vsub.f32 %v4290_v19, %v3831_v7  ;;  %v1781_v33 = vsub.f32 %v4291_v51, %v3831_v7 }
 0x269   :  { %2049 = vst [vmem:[#allocation8 + $0xf0] sm:$0xff] %v1985_v35 }
 0x26a   :  { %2050 = vst [vmem:[#allocation8 + $0xf8] sm:$0xff] %v1986_v45  ;;  %v1945_v58 = vpop.permute.xlu2 %1944  ;;  %v4292_v45 = vld [vmem:[#allocation43_spill] sm:$0xff] }
 0x26b   :  { %2079 = vst [vmem:[#allocation8 + $0x1e0] sm:$0xff] %v2015_v5  ;;  %v1975_v10 = vadd.f32 %v1945_v58, %v1863_v59  ;;  %v1976_v57 = vadd.f32 %v1945_v58, %v1864_v15  ;;  %v1977_v3 = vadd.f32 %v1945_v58, %v1865_v6  ;;  %v1978_v43 = vadd.f32 %v1945_v58, %v1866_v22 }
 0x26c   :  { %2080 = vst [vmem:[#allocation8 + $0x1e8] sm:$0xff] %v2016_v16  ;;  %v2007_v13 = vadd.f32 %v1945_v58, %v1895_v37  ;;  %v2008_v9 = vadd.f32 %v1945_v58, %v1896_v53  ;;  %v2009_v61 = vadd.f32 %v1945_v58, %v1897_v23  ;;  %v2010_v2 = vadd.f32 %v1945_v58, %v1898_v27 }
 0x26d   :  { %2081 = vst [vmem:[#allocation8 + $0x1f0] sm:$0xff] %v2017_v47  ;;  %v1782_v5 = vsub.f32 %v4292_v45, %v3831_v7 }
 0x26e   :  { %2082 = vst [vmem:[#allocation8 + $0x1f8] sm:$0xff] %v2018_v4 }
 0x26f   :  { %2039 = vst [vmem:[#allocation8 + $0xa0] sm:$0xff] %v1975_v10 }
 0x270   :  { %2040 = vst [vmem:[#allocation8 + $0xa8] sm:$0xff] %v1976_v57 }
 0x271   :  { %2041 = vst [vmem:[#allocation8 + $0xb0] sm:$0xff] %v1977_v3 }
 0x272   :  { %2042 = vst [vmem:[#allocation8 + $0xb8] sm:$0xff] %v1978_v43 }
 0x273   :  { %2071 = vst [vmem:[#allocation8 + $0x1a0] sm:$0xff] %v2007_v13 }
 0x274   :  { %2072 = vst [vmem:[#allocation8 + $0x1a8] sm:$0xff] %v2008_v9 }
 0x275   :  { %2073 = vst [vmem:[#allocation8 + $0x1b0] sm:$0xff] %v2009_v61 }
 0x276   :  { %2074 = vst [vmem:[#allocation8 + $0x1b8] sm:$0xff] %v2010_v2 }
 0x277   :  { %v1837_v31 = vpop.permute.xlu1 %1836 }
 0x278   :  { %v1867_v21 = vmul.f32 %v1837_v31, %v1747_v54  ;;  %v1868_v25 = vmul.f32 %v1837_v31, %v1748_v11  ;;  %v1869_v39 = vmul.f32 %v1837_v31, %v1749_v29  ;;  %v1870_v42 = vmul.f32 %v1837_v31, %v1750_v0 }
 0x279   :  { %v1899_v50 = vmul.f32 %v1837_v31, %v1779_v63  ;;  %v1900_v55 = vmul.f32 %v1837_v31, %v1780_v60  ;;  %v1901_v20 = vmul.f32 %v1837_v31, %v1781_v33  ;;  %v1902_v44 = vmul.f32 %v1837_v31, %v1782_v5 }
 0x27f   :  { %v1949_v8 = vpop.permute.xlu1 %1948 }
 0x280   :  { %v1979_v36 = vadd.f32 %v1949_v8, %v1867_v21  ;;  %v1980_v35 = vadd.f32 %v1949_v8, %v1868_v25  ;;  %v1981_v38 = vadd.f32 %v1949_v8, %v1869_v39  ;;  %v1982_v46 = vadd.f32 %v1949_v8, %v1870_v42 }
 0x281   :  { %v2011_v16 = vadd.f32 %v1949_v8, %v1899_v50  ;;  %v2012_v52 = vadd.f32 %v1949_v8, %v1900_v55  ;;  %v2013_v47 = vadd.f32 %v1949_v8, %v1901_v20  ;;  %v2014_v26 = vadd.f32 %v1949_v8, %v1902_v44 }
 0x282   :  { %2043 = vst [vmem:[#allocation8 + $0xc0] sm:$0xff] %v1979_v36 }
 0x283   :  { %2044 = vst [vmem:[#allocation8 + $0xc8] sm:$0xff] %v1980_v35 }
 0x284   :  { %2045 = vst [vmem:[#allocation8 + $0xd0] sm:$0xff] %v1981_v38 }
 0x285   :  { %2046 = vst [vmem:[#allocation8 + $0xd8] sm:$0xff] %v1982_v46 }
 0x286   :  { %2075 = vst [vmem:[#allocation8 + $0x1c0] sm:$0xff] %v2011_v16 }
 0x287   :  { %2076 = vst [vmem:[#allocation8 + $0x1c8] sm:$0xff] %v2012_v52 }
 0x288   :  { %2077 = vst [vmem:[#allocation8 + $0x1d0] sm:$0xff] %v2013_v47 }
 0x289   :  { %2078 = vst [vmem:[#allocation8 + $0x1d8] sm:$0xff] %v2014_v26 }
 0x28a   :  { %2095 = dma.vmem_to_hbm [thread:$0]  %s2088_s10, 8192, %s2090_s13, [#allocation4], %s2434_s23, %s2434_s23, %s2435_s24  }
 0x28b   :  { %2431 = dma.done.wait [#allocation4], 8192  }
 0x28c   :  { %2432 = vsyncadd [#allocation4], 4294959104 }
 0x28d   :  { %2100 = vsyncpa [#allocation3], 1 }
 0x28e   :  { %2101 = vsyncpa [#allocation6], 1 }
 0x28f   :  { %2102 = vsyncpa [#allocation4], 1 }

</bundles_post_ra>
